<compile_context>
chip_gen: v6e
topology: v6e:2x2x1
jax: 0.10.0
libtpu: 0.0.40
codegen_flags: <defaults>
</compile_context>

<pallas_src>
import math
import jax
import jax.numpy as jnp
from jax.experimental import pallas as pl
from jax.experimental.pallas import tpu as pltpu


def childsum_kernel(h1_ref, h2_ref, c1_ref, c2_ref,
                    wsum_ref, bsum_ref, wf1_ref, bf1_ref, wf2_ref, bf2_ref,
                    h_out_ref, c_out_ref):
    D = h1_ref.shape[-1]
    h1 = h1_ref[...]
    h2 = h2_ref[...]

    # Shared i/g/o gates: two accumulating dots over the sublane-aligned row
    # halves of the resident packed weight (no concat copy in VMEM).
    # Column order along the packed 3D axis: [i | g | o]; bias pre-summed.
    z = (jnp.dot(h1, wsum_ref[:D, :], preferred_element_type=jnp.float32)
         + jnp.dot(h2, wsum_ref[D:, :], preferred_element_type=jnp.float32)
         + bsum_ref[...].astype(jnp.float32))                      # (TB, 3D)

    # Forget gates each depend on a single child.
    zf1 = (jnp.dot(h1, wf1_ref[...], preferred_element_type=jnp.float32)
           + bf1_ref[...].astype(jnp.float32))
    zf2 = (jnp.dot(h2, wf2_ref[...], preferred_element_type=jnp.float32)
           + bf2_ref[...].astype(jnp.float32))

    i_g = jax.nn.sigmoid(z[:, 0 * D:1 * D])
    g_g = jnp.tanh(z[:, 1 * D:2 * D])
    o_g = jax.nn.sigmoid(z[:, 2 * D:3 * D])
    f_1 = jax.nn.sigmoid(zf1)
    f_2 = jax.nn.sigmoid(zf2)

    c = (i_g * g_g
         + f_1 * c1_ref[...].astype(jnp.float32)
         + f_2 * c2_ref[...].astype(jnp.float32))
    h = o_g * jnp.tanh(c)

    h_out_ref[...] = h.astype(h_out_ref.dtype)
    c_out_ref[...] = c.astype(c_out_ref.dtype)


def _pick_batch_tile(B, block_b):
    """Pick the batch tile: multiple of 8, large, >=4 grid steps when cheap."""
    TB = max(8, (min(block_b, B) // 8) * 8)
    # v7x megacore ("parallel" batch axis): keep >=4 grid steps (>=2 per
    # TensorCore) so each core still double-buffers across steps, as long as
    # tiles stay >=256 rows (enough to amortize per-step overhead).
    if B >= 4 * 256:
        TB = min(TB, ((pl.cdiv(B, 4) + 7) // 8) * 8)
    # Prefer a tile that divides B (avoids the ragged tail block) if a
    # not-much-smaller divisor exists; otherwise let Pallas pad the final
    # block (no wrapper-side jnp.pad / re-slice HBM pass either way).
    if B % TB != 0:
        best = max((t for t in range(8, TB + 1, 8) if B % t == 0),
                   default=None)
        if best is not None and best >= max(128, TB // 2):
            TB = best
    return TB


def child_sum(h1, h2, c1, c2, params, *, block_b=1024,
              act_dtype=jnp.bfloat16):
    """Apply the ChildSum cell to a batch of tree nodes.

    Batch many nodes per call (B >= 128) to amortize weight DMA + call
    overhead. Activations travel as `act_dtype` (bf16 by default); matmul
    accumulation and the cell-state update stay in f32 inside the kernel.
    """
    wsum, bsum, wf1, bf1, wf2, bf2 = params
    B, D = h1.shape
    assert D % 128 == 0, "dim_hidden must be a multiple of 128 (TPU lane tile)"

    # Halve activation HBM traffic (the kernel is bandwidth bound at D~128).
    h1, h2, c1, c2 = (x.astype(act_dtype) for x in (h1, h2, c1, c2))

    TB = _pick_batch_tile(B, block_b)
    n_blocks = pl.cdiv(B, TB)

    act = pl.BlockSpec((TB, D), lambda i: (i, 0))
    # Constant-index weights: single-buffered (index never changes), so the
    # weight VMEM cost is 1x, keeping large D viable on v7x's 64 MiB VMEM.
    const = lambda shape: pl.BlockSpec(shape, lambda i: (0, 0),
                                       pipeline_mode=pl.Buffered(1))

    # VMEM budget: double-buffered activation/output tiles + single-buffered
    # weights + in-kernel f32 temporaries (z, zf1/zf2, 5 gates, c, h, casts).
    act_itemsize = jnp.dtype(act_dtype).itemsize
    w_itemsize = jnp.dtype(wsum.dtype).itemsize
    act_bytes = TB * D * act_itemsize
    w_bytes = (2 * D * 3 * D + 2 * D * D + 5 * D) * w_itemsize
    tmp_bytes = 16 * TB * D * 4
    vmem_limit = int(2 * 6 * act_bytes + w_bytes + tmp_bytes + (2 << 20))
    vmem_limit = min(vmem_limit, 100 * 1024 * 1024)

    h_out, c_out = pl.pallas_call(
        childsum_kernel,
        out_shape=(jax.ShapeDtypeStruct((B, D), act_dtype),
                   jax.ShapeDtypeStruct((B, D), act_dtype)),
        grid=(n_blocks,),
        in_specs=[
            act, act, act, act,
            const((2 * D, 3 * D)), const((1, 3 * D)),   # shared i/g/o weights
            const((D, D)), const((1, D)),               # f1
            const((D, D)), const((1, D)),               # f2
        ],
        out_specs=(act, act),
        compiler_params=pltpu.CompilerParams(
            dimension_semantics=("parallel",),          # v7x: shard over 2 TCs
            vmem_limit_bytes=vmem_limit),
    )(h1, h2, c1, c2, wsum, bsum, wf1, bf1, wf2, bf2)
    return h_out, c_out


def init_linear(key, dim):
    """PyTorch nn.Linear default init, stored as (in, out) for h @ W."""
    kw, kb = jax.random.split(key)
    bound = 1.0 / math.sqrt(dim)
    w = jax.random.uniform(kw, (dim, dim), jnp.float32, -bound, bound)
    b = jax.random.uniform(kb, (dim,), jnp.float32, -bound, bound)
    return w, b


def build_params(key, dim, param_dtype=jnp.bfloat16):
    """Init the 8 nn.Linear layers and pack them for the kernel.

    param_dtype=jnp.bfloat16 halves weight HBM/VMEM footprint and feeds the
    MXU natively; the kernel still accumulates in f32.
    """
    names = ["i1", "i2", "g1", "g2", "f1", "f2", "o1", "o2"]
    keys = jax.random.split(key, 8)
    raw = {n: init_linear(k, dim) for n, k in zip(names, keys)}

    # Shared i/g/o gates: rows [h1-block ; h2-block], columns [i | g | o].
    wsum = jnp.concatenate([
        jnp.concatenate([raw["i1"][0], raw["g1"][0], raw["o1"][0]], axis=1),
        jnp.concatenate([raw["i2"][0], raw["g2"][0], raw["o2"][0]], axis=1),
    ], axis=0)                                                      # (2D, 3D)
    bsum = jnp.concatenate([raw["i1"][1] + raw["i2"][1],
                            raw["g1"][1] + raw["g2"][1],
                            raw["o1"][1] + raw["o2"][1]])[None, :]  # (1, 3D)
    wf1, bf1 = raw["f1"][0], raw["f1"][1][None, :]
    wf2, bf2 = raw["f2"][0], raw["f2"][1][None, :]

    packed = tuple(p.astype(param_dtype)
                   for p in (wsum, bsum, wf1, bf1, wf2, bf2))
    return packed, raw


def reference(h1, h2, c1, c2, raw):
    """Pure-JAX mirror of the PyTorch forward (unpacked weights, f32 math)."""
    lin = lambda x, p: x @ p[0] + p[1]
    i = jax.nn.sigmoid(lin(h1, raw["i1"]) + lin(h2, raw["i2"]))
    g = jnp.tanh(lin(h1, raw["g1"]) + lin(h2, raw["g2"]))
    f1 = jax.nn.sigmoid(lin(h1, raw["f1"]))
    f2 = jax.nn.sigmoid(lin(h2, raw["f2"]))
    o = jax.nn.sigmoid(lin(h1, raw["o1"]) + lin(h2, raw["o2"]))
    c = i * g + f1 * c1 + f2 * c2
    h = o * jnp.tanh(c)
    return h, c


if __name__ == "__main__":
    # Small demo: lane-aligned hidden dim, 4 grid steps (exercises pipelining,
    # constant single-buffered weights, and the megacore-parallel batch axis).
    B, D = 512, 128

    key = jax.random.PRNGKey(0)
    k_h1, k_h2, k_c1, k_c2, k_p = jax.random.split(key, 5)
    h1 = jax.random.normal(k_h1, (B, D), jnp.float32)
    h2 = jax.random.normal(k_h2, (B, D), jnp.float32)
    c1 = jax.random.normal(k_c1, (B, D), jnp.float32)
    c2 = jax.random.normal(k_c2, (B, D), jnp.float32)
    params, raw = build_params(k_p, D, param_dtype=jnp.bfloat16)

    h_out, c_out = jax.block_until_ready(
        child_sum(h1, h2, c1, c2, params, block_b=128))
    h_out = h_out.astype(jnp.float32)
    c_out = c_out.astype(jnp.float32)

    # (1) Tight check against a reference fed the *same* bf16-rounded
    #     activations / weights (isolates kernel correctness from quantization).
    q = lambda x: x.astype(jnp.bfloat16).astype(jnp.float32)
    raw_q = {k: (q(w), q(b)) for k, (w, b) in raw.items()}
    h_ref_q, c_ref_q = reference(q(h1), q(h2), q(c1), q(c2), raw_q)
    assert jnp.allclose(h_out, h_ref_q, atol=2e-2, rtol=2e-2)
    assert jnp.allclose(c_out, c_ref_q, atol=2e-2, rtol=2e-2)

    # (2) Loose sanity check against the exact f32 PyTorch-equivalent forward
    #     (bf16 activation/weight rounding is the only difference).
    h_ref, c_ref = reference(h1, h2, c1, c2, raw)
    assert jnp.allclose(h_out, h_ref, atol=1e-1, rtol=1e-1)
    assert jnp.allclose(c_out, c_ref, atol=1e-1, rtol=1e-1)

    print("KERNEL_OK")
</pallas_src>

<mosaic_0001>
module attributes {stable_mosaic.version = 11 : i64} {
  func.func @childsum_kernel(%arg0: i32, %arg1: memref<128x128xbf16, #tpu.memory_space<vmem>>, %arg2: memref<128x128xbf16, #tpu.memory_space<vmem>>, %arg3: memref<128x128xbf16, #tpu.memory_space<vmem>>, %arg4: memref<128x128xbf16, #tpu.memory_space<vmem>>, %arg5: memref<256x384xbf16, #tpu.memory_space<vmem>>, %arg6: memref<1x384xbf16, #tpu.memory_space<vmem>>, %arg7: memref<128x128xbf16, #tpu.memory_space<vmem>>, %arg8: memref<1x128xbf16, #tpu.memory_space<vmem>>, %arg9: memref<128x128xbf16, #tpu.memory_space<vmem>>, %arg10: memref<1x128xbf16, #tpu.memory_space<vmem>>, %arg11: memref<128x128xbf16, #tpu.memory_space<vmem>>, %arg12: memref<128x128xbf16, #tpu.memory_space<vmem>>) attributes {dimension_semantics = [#tpu.dimension_semantics<parallel>], iteration_bounds = array<i64: 4>, scalar_prefetch = 0 : i64, scratch_operands = 0 : i64, tpu.core_type = #tpu.core_type<tc>, window_params = [{transform_indices = @transform_0, window_bounds = array<i64: 128, 128>}, {transform_indices = @transform_1, window_bounds = array<i64: 128, 128>}, {transform_indices = @transform_2, window_bounds = array<i64: 128, 128>}, {transform_indices = @transform_3, window_bounds = array<i64: 128, 128>}, {pipeline_mode = #tpu.pipeline_mode<synchronous>, transform_indices = @transform_4, window_bounds = array<i64: 256, 384>}, {pipeline_mode = #tpu.pipeline_mode<synchronous>, transform_indices = @transform_5, window_bounds = array<i64: 1, 384>}, {pipeline_mode = #tpu.pipeline_mode<synchronous>, transform_indices = @transform_6, window_bounds = array<i64: 128, 128>}, {pipeline_mode = #tpu.pipeline_mode<synchronous>, transform_indices = @transform_7, window_bounds = array<i64: 1, 128>}, {pipeline_mode = #tpu.pipeline_mode<synchronous>, transform_indices = @transform_8, window_bounds = array<i64: 128, 128>}, {pipeline_mode = #tpu.pipeline_mode<synchronous>, transform_indices = @transform_9, window_bounds = array<i64: 1, 128>}, {transform_indices = @transform_10, window_bounds = array<i64: 128, 128>}, {transform_indices = @transform_11, window_bounds = array<i64: 128, 128>}]} {
    %c0 = arith.constant 0 : index
    %c0_0 = arith.constant 0 : index
    %0 = vector.load %arg1[%c0, %c0_0] : memref<128x128xbf16, #tpu.memory_space<vmem>>, vector<128x128xbf16>
    %c0_1 = arith.constant 0 : index
    %c0_2 = arith.constant 0 : index
    %1 = vector.load %arg2[%c0_1, %c0_2] : memref<128x128xbf16, #tpu.memory_space<vmem>>, vector<128x128xbf16>
    %c0_3 = arith.constant 0 : index
    %c0_4 = arith.constant 0 : index
    %2 = vector.load %arg5[%c0_3, %c0_4] : memref<256x384xbf16, #tpu.memory_space<vmem>>, vector<128x384xbf16>
    %cst = arith.constant dense<0.000000e+00> : vector<128x384xf32>
    %3 = tpu.matmul %0, %2, %cst {dimension_numbers = #tpu.dot_dimension_numbers<[1], [0], [0], [1], [0, 0, 1, 1], [], []>} : vector<128x128xbf16>, vector<128x384xbf16>, vector<128x384xf32> -> vector<128x384xf32>
    %c128 = arith.constant 128 : index
    %c0_5 = arith.constant 0 : index
    %4 = vector.load %arg5[%c128, %c0_5] : memref<256x384xbf16, #tpu.memory_space<vmem>>, vector<128x384xbf16>
    %cst_6 = arith.constant dense<0.000000e+00> : vector<128x384xf32>
    %5 = tpu.matmul %1, %4, %cst_6 {dimension_numbers = #tpu.dot_dimension_numbers<[1], [0], [0], [1], [0, 0, 1, 1], [], []>} : vector<128x128xbf16>, vector<128x384xbf16>, vector<128x384xf32> -> vector<128x384xf32>
    %6 = arith.addf %3, %5 : vector<128x384xf32>
    %c0_7 = arith.constant 0 : index
    %c0_8 = arith.constant 0 : index
    %7 = vector.load %arg6[%c0_7, %c0_8] : memref<1x384xbf16, #tpu.memory_space<vmem>>, vector<1x384xbf16>
    %8 = arith.extf %7 : vector<1x384xbf16> to vector<1x384xf32>
    %9 = vector.broadcast %8 : vector<1x384xf32> to vector<128x384xf32>
    %10 = arith.addf %6, %9 : vector<128x384xf32>
    %c0_9 = arith.constant 0 : index
    %c0_10 = arith.constant 0 : index
    %11 = vector.load %arg7[%c0_9, %c0_10] : memref<128x128xbf16, #tpu.memory_space<vmem>>, vector<128x128xbf16>
    %cst_11 = arith.constant dense<0.000000e+00> : vector<128x128xf32>
    %12 = tpu.matmul %0, %11, %cst_11 {dimension_numbers = #tpu.dot_dimension_numbers<[1], [0], [0], [1], [0, 0, 1, 1], [], []>} : vector<128x128xbf16>, vector<128x128xbf16>, vector<128x128xf32> -> vector<128x128xf32>
    %c0_12 = arith.constant 0 : index
    %c0_13 = arith.constant 0 : index
    %13 = vector.load %arg8[%c0_12, %c0_13] : memref<1x128xbf16, #tpu.memory_space<vmem>>, vector<1x128xbf16>
    %14 = arith.extf %13 : vector<1x128xbf16> to vector<1x128xf32>
    %15 = vector.broadcast %14 : vector<1x128xf32> to vector<128x128xf32>
    %16 = arith.addf %12, %15 : vector<128x128xf32>
    %c0_14 = arith.constant 0 : index
    %c0_15 = arith.constant 0 : index
    %17 = vector.load %arg9[%c0_14, %c0_15] : memref<128x128xbf16, #tpu.memory_space<vmem>>, vector<128x128xbf16>
    %cst_16 = arith.constant dense<0.000000e+00> : vector<128x128xf32>
    %18 = tpu.matmul %1, %17, %cst_16 {dimension_numbers = #tpu.dot_dimension_numbers<[1], [0], [0], [1], [0, 0, 1, 1], [], []>} : vector<128x128xbf16>, vector<128x128xbf16>, vector<128x128xf32> -> vector<128x128xf32>
    %c0_17 = arith.constant 0 : index
    %c0_18 = arith.constant 0 : index
    %19 = vector.load %arg10[%c0_17, %c0_18] : memref<1x128xbf16, #tpu.memory_space<vmem>>, vector<1x128xbf16>
    %20 = arith.extf %19 : vector<1x128xbf16> to vector<1x128xf32>
    %21 = vector.broadcast %20 : vector<1x128xf32> to vector<128x128xf32>
    %22 = arith.addf %18, %21 : vector<128x128xf32>
    %23 = vector.extract_strided_slice %10 {offsets = [0, 0], sizes = [128, 128], strides = [1, 1]} : vector<128x384xf32> to vector<128x128xf32>
    %24 = arith.negf %23 : vector<128x128xf32>
    %25 = math.exp %24 : vector<128x128xf32>
    %cst_19 = arith.constant 1.000000e+00 : f32
    %26 = vector.broadcast %cst_19 : f32 to vector<128x128xf32>
    %27 = arith.addf %26, %25 : vector<128x128xf32>
    %28 = arith.divf %26, %27 : vector<128x128xf32>
    %29 = vector.extract_strided_slice %10 {offsets = [0, 128], sizes = [128, 128], strides = [1, 1]} : vector<128x384xf32> to vector<128x128xf32>
    %30 = math.tanh %29 : vector<128x128xf32>
    %31 = vector.extract_strided_slice %10 {offsets = [0, 256], sizes = [128, 128], strides = [1, 1]} : vector<128x384xf32> to vector<128x128xf32>
    %32 = arith.negf %31 : vector<128x128xf32>
    %33 = math.exp %32 : vector<128x128xf32>
    %cst_20 = arith.constant 1.000000e+00 : f32
    %34 = vector.broadcast %cst_20 : f32 to vector<128x128xf32>
    %35 = arith.addf %34, %33 : vector<128x128xf32>
    %36 = arith.divf %34, %35 : vector<128x128xf32>
    %37 = arith.negf %16 : vector<128x128xf32>
    %38 = math.exp %37 : vector<128x128xf32>
    %cst_21 = arith.constant 1.000000e+00 : f32
    %39 = vector.broadcast %cst_21 : f32 to vector<128x128xf32>
    %40 = arith.addf %39, %38 : vector<128x128xf32>
    %41 = arith.divf %39, %40 : vector<128x128xf32>
    %42 = arith.negf %22 : vector<128x128xf32>
    %43 = math.exp %42 : vector<128x128xf32>
    %cst_22 = arith.constant 1.000000e+00 : f32
    %44 = vector.broadcast %cst_22 : f32 to vector<128x128xf32>
    %45 = arith.addf %44, %43 : vector<128x128xf32>
    %46 = arith.divf %44, %45 : vector<128x128xf32>
    %47 = arith.mulf %28, %30 : vector<128x128xf32>
    %c0_23 = arith.constant 0 : index
    %c0_24 = arith.constant 0 : index
    %48 = vector.load %arg3[%c0_23, %c0_24] : memref<128x128xbf16, #tpu.memory_space<vmem>>, vector<128x128xbf16>
    %49 = arith.extf %48 : vector<128x128xbf16> to vector<128x128xf32>
    %50 = arith.mulf %41, %49 : vector<128x128xf32>
    %51 = arith.addf %47, %50 : vector<128x128xf32>
    %c0_25 = arith.constant 0 : index
    %c0_26 = arith.constant 0 : index
    %52 = vector.load %arg4[%c0_25, %c0_26] : memref<128x128xbf16, #tpu.memory_space<vmem>>, vector<128x128xbf16>
    %53 = arith.extf %52 : vector<128x128xbf16> to vector<128x128xf32>
    %54 = arith.mulf %46, %53 : vector<128x128xf32>
    %55 = arith.addf %51, %54 : vector<128x128xf32>
    %56 = math.tanh %55 : vector<128x128xf32>
    %57 = arith.mulf %36, %56 : vector<128x128xf32>
    %58 = arith.truncf %57 : vector<128x128xf32> to vector<128x128xbf16>
    %c0_27 = arith.constant 0 : index
    %c0_28 = arith.constant 0 : index
    %59 = vector.load %arg11[%c0_27, %c0_28] : memref<128x128xbf16, #tpu.memory_space<vmem>>, vector<128x128xbf16>
    tpu.vector_store %arg11[%c0_27, %c0_28], %58 {strides = array<i32>} : memref<128x128xbf16, #tpu.memory_space<vmem>>, vector<128x128xbf16>,
    %60 = arith.truncf %55 : vector<128x128xf32> to vector<128x128xbf16>
    %c0_29 = arith.constant 0 : index
    %c0_30 = arith.constant 0 : index
    %61 = vector.load %arg12[%c0_29, %c0_30] : memref<128x128xbf16, #tpu.memory_space<vmem>>, vector<128x128xbf16>
    tpu.vector_store %arg12[%c0_29, %c0_30], %60 {strides = array<i32>} : memref<128x128xbf16, #tpu.memory_space<vmem>>, vector<128x128xbf16>,
    return
  }
  func.func @transform_0(%arg0: i32) -> (i32, i32) {
    %c0_i32 = arith.constant 0 : i32
    %c0_i32_0 = arith.constant 0 : i32
    return %arg0, %c0_i32 : i32, i32
  }
  func.func @transform_1(%arg0: i32) -> (i32, i32) {
    %c0_i32 = arith.constant 0 : i32
    %c0_i32_0 = arith.constant 0 : i32
    return %arg0, %c0_i32 : i32, i32
  }
  func.func @transform_2(%arg0: i32) -> (i32, i32) {
    %c0_i32 = arith.constant 0 : i32
    %c0_i32_0 = arith.constant 0 : i32
    return %arg0, %c0_i32 : i32, i32
  }
  func.func @transform_3(%arg0: i32) -> (i32, i32) {
    %c0_i32 = arith.constant 0 : i32
    %c0_i32_0 = arith.constant 0 : i32
    return %arg0, %c0_i32 : i32, i32
  }
  func.func @transform_4(%arg0: i32) -> (i32, i32) {
    %c0_i32 = arith.constant 0 : i32
    %c0_i32_0 = arith.constant 0 : i32
    %c0_i32_1 = arith.constant 0 : i32
    return %c0_i32, %c0_i32_0 : i32, i32
  }
  func.func @transform_5(%arg0: i32) -> (i32, i32) {
    %c0_i32 = arith.constant 0 : i32
    %c0_i32_0 = arith.constant 0 : i32
    %c0_i32_1 = arith.constant 0 : i32
    return %c0_i32, %c0_i32_0 : i32, i32
  }
  func.func @transform_6(%arg0: i32) -> (i32, i32) {
    %c0_i32 = arith.constant 0 : i32
    %c0_i32_0 = arith.constant 0 : i32
    %c0_i32_1 = arith.constant 0 : i32
    return %c0_i32, %c0_i32_0 : i32, i32
  }
  func.func @transform_7(%arg0: i32) -> (i32, i32) {
    %c0_i32 = arith.constant 0 : i32
    %c0_i32_0 = arith.constant 0 : i32
    %c0_i32_1 = arith.constant 0 : i32
    return %c0_i32, %c0_i32_0 : i32, i32
  }
  func.func @transform_8(%arg0: i32) -> (i32, i32) {
    %c0_i32 = arith.constant 0 : i32
    %c0_i32_0 = arith.constant 0 : i32
    %c0_i32_1 = arith.constant 0 : i32
    return %c0_i32, %c0_i32_0 : i32, i32
  }
  func.func @transform_9(%arg0: i32) -> (i32, i32) {
    %c0_i32 = arith.constant 0 : i32
    %c0_i32_0 = arith.constant 0 : i32
    %c0_i32_1 = arith.constant 0 : i32
    return %c0_i32, %c0_i32_0 : i32, i32
  }
  func.func @transform_10(%arg0: i32) -> (i32, i32) {
    %c0_i32 = arith.constant 0 : i32
    %c0_i32_0 = arith.constant 0 : i32
    return %arg0, %c0_i32 : i32, i32
  }
  func.func @transform_11(%arg0: i32) -> (i32, i32) {
    %c0_i32 = arith.constant 0 : i32
    %c0_i32_0 = arith.constant 0 : i32
    return %arg0, %c0_i32 : i32, i32
  }
}

</mosaic_0001>

<bundles_post_ra>
// kernel: tpu_custom_call.1
= control target key start
LH: loop header
LB: loop body
LE: loop exit
PB: predicated region body
PF: predicated region fallthrough
CT: control target
= control target key end

     0   :  { %s5313_s0 = inlined_call_operand.hbm [shape: bf16[512,128], index: 0, kind: input, shape index: {}]   ;;  %s5314_s1 = inlined_call_operand.hbm [shape: bf16[512,128], index: 1, kind: input, shape index: {}]   ;;  %s5315_s2 = inlined_call_operand.hbm [shape: bf16[512,128], index: 2, kind: input, shape index: {}]   ;;  %s5316_s3 = inlined_call_operand.hbm [shape: bf16[512,128], index: 3, kind: input, shape index: {}]   ;;  %s5317_s4 = inlined_call_operand.hbm [shape: bf16[256,384], index: 4, kind: input, shape index: {}]   ;;  %s5318_s5 = inlined_call_operand.vmem [shape: bf16[1,384], index: 5, kind: input, shape index: {}]   ;;  %s5319_s6 = inlined_call_operand.hbm [shape: bf16[128,128], index: 6, kind: input, shape index: {}]   ;;  %s5320_s7 = inlined_call_operand.vmem [shape: bf16[1,128], index: 7, kind: input, shape index: {}]   ;;  %s5321_s8 = inlined_call_operand.hbm [shape: bf16[128,128], index: 8, kind: input, shape index: {}]   ;;  %s5322_s9 = inlined_call_operand.vmem [shape: bf16[1,128], index: 9, kind: input, shape index: {}]   ;;  %s5323_s10 = inlined_call_operand.hbm [shape: bf16[512,128], index: 10, kind: output, shape index: {0}]   ;;  %s5324_s11 = inlined_call_operand.hbm [shape: bf16[512,128], index: 11, kind: output, shape index: {1}]  }
   0x1   :  { %5344 = sst [smem:[#allocation33_spill]] %s5313_s0 }
   0x2   :  { %5345 = sst [smem:[#allocation34_spill]] %s5314_s1 }
   0x3   :  { %5346 = sst [smem:[#allocation35_spill]] %s5317_s4 }
   0x4   :  { %5347 = sst [smem:[#allocation36_spill]] %s5319_s6 }
   0x5   :  { %5348 = sst [smem:[#allocation37_spill]] %s5321_s8 }
   0x6   :  { %5349 = sst [smem:[#allocation38_spill]] %s5323_s10 }
   0x7   :  { %5350 = sst [smem:[#allocation39_spill]] %s5324_s11 }
   0x8   :  { %17 = vsyncpa [#allocation3], 0 }
   0x9   :  { %19 = vsyncpa [#allocation3 + $0x1], 0 }
   0xa   :  { %20 = vsyncpa [#allocation6], 0 }
   0xb   :  { %22 = vsyncpa [#allocation6 + $0x1], 0 }
   0xc   :  { %23 = vsyncpa [#allocation9], 0 }
   0xd   :  { %25 = vsyncpa [#allocation9 + $0x1], 0 }
   0xe   :  { %26 = vsyncpa [#allocation12], 0 }
   0xf   :  { %27 = vsyncpa [#allocation4], 0 }
  0x10   :  { %29 = vsyncpa [#allocation4 + $0x1], 0 }
  0x11   :  { %30 = vsyncpa [#allocation16], 0 }
  0x12   :  { %32 = vsyncpa [#allocation16 + $0x1], 0  ;;  %s4345_s17 = smov 0   ;;  %s4347_s18 = smov 0  }
  0x13   :  { %s4349_s19 = smov 0   ;;  %s4351_s20 = smov 0  }
  0x14 LB: > { %5351 = sst [smem:[#allocation24_spill]] %s4255_s17  ;;  %s4366_s21 = sadd.s32 4294967295, %s4267_s20   ;;  %s4267_s20 = sphi %s4351_s20, %s5397_s20   ;;  %s4263_s19 = sphi %s4349_s19, %s5401_s19   ;;  %s4259_s18 = sphi %s4347_s18, %s5400_s18   ;;  %s4255_s17 = sphi %s4345_s17, %s5399_s17  }
  0x15   : > { %s2833_s22 = sadd.s32 4294967294, %s4267_s20   ;;  %s4370_s23 = sadd.s32 1, %s4267_s20  }
  0x16   : > { %5352 = sst [smem:[#allocation25_spill]] %s4370_s23  ;;  %s45_s24 = sadd.s32 1, %s4263_s19 }
  0x17   : > { %s42_s25 = ssub.s32 %s4267_s20, %s4370_s23  ;;  %p52_p0 = scmp.ne.s32.totalorder %s4263_s19, %s4259_s18 }
  0x18   : > { %p43_p1 = scmp.eq.s32.totalorder %s42_s25, 0  ;;  %p53_p2 = scmp.eq.s32.totalorder %s4267_s20, 0 }
  0x19   : > { %p58_p3 = scmp.ne.s32.totalorder %s4259_s18, %s4255_s17  ;;  %p5328_p4 = scmp.eq.s32.totalorder %s4366_s21, 0 }
  0x1a   : > { %s4382_s26 = scalar_select %p43_p1, %s4263_s19, %s45_s24  }
  0x1b   : > { %p4384_p5 = por %p53_p2, %p52_p0  ;;  %p4390_p6 = por %p5328_p4, %p58_p3 }
  0x1c   : > { %5353 = sst [smem:[#allocation26_spill]] %s4382_s26  ;;  %p286_p7 = scmp.eq.s32.totalorder %s4366_s21, 3 }
  0x1d   : > { %s5355_s28 = scalar_select %p4390_p6, 1, 0 }
  0x1e   : > { %p292_p8 = scmp.eq.s32.totalorder %s2833_s22, 3  ;;  %p2834_p9 = scmp.ge.s32.totalorder %s4267_s20, 1 }
  0x1f   : > { %p325_p10 = scmp.lt.s32.totalorder %s4267_s20, 5  ;;  %p4397_p11 = por %p286_p7, %p52_p0 }
  0x20   : > { %p4401_p12 = por %p292_p8, %p58_p3  ;;  %s4269_s13 = smov [#allocation10]  }
  0x21   : > { %s5356_s29 = scalar_select %p4397_p11, 1, 0 }
  0x22   : > { %s5357_s30 = scalar_select %p4401_p12, 1, 0 }
  0x23   : > { %p4405_p13 = pnand %p2834_p9, %p325_p10  ;;  %s337_s14 = sshll.u32 %s4269_s13, 4  ;;  %s338_s14 = int_to_ptr.vmem [resolvable:$true] %s337_s14 }
  0x24   : > { %5358 = sst [smem:[#allocation27_spill]] %s5357_s30  ;;  %s4270_s16 = smov [#allocation11]  }
  0x25   : > { %s5359_s12 = scalar_select %p4405_p13, 1, 0 }
  0x26   : > { %p3471_p1 = pneg %p4405_p13  ;;  %s353_s22 = sshll.u32 %s4270_s16, 4  ;;  %s354_s22 = int_to_ptr.vmem [resolvable:$true] %s353_s22 }
  0x27   : > { %s3978_s24 = scalar_lea.vmem %s338_s14, 6144  ;;  %p3986_p9 = scmp.lt.s32.totalorder %s338_s14, %s338_s14 }
  0x28   : > { %p4413_p2 = pnand %p3471_p1, %p5328_p4  ;;  %p3979_p3 = scmp.ne.s32.totalorder %s338_s14, %s3978_s24 }
  0x29   : > { %p3987_p10 = scmp.lt.s32.totalorder %s3978_s24, %s3978_s24 }
  0x2a   : > { %s5360_s15 = scalar_select %p4413_p2, 1, 0 }
  0x2b   : > { %p5339_p0 = pneg %p4413_p2  ;;  %p3988_p12 = por %p3987_p10, %p3986_p9 }
  0x2d   : > { %p3981_p7 = pnand %p3979_p3, %p5339_p0 }
  0x2f   : > { %p3982_p8 = pneg %p3981_p7 }
  0x31   : > { %p3989_p11 = pnand %p3988_p12, %p3982_p8 }
  0x33   : > { %3992 = shalt.err (!%p3989_p11)
}
  0x34   : > { %s4271_s25 = smov 192   ;;  %s4272_s13 = smov 12  }
  0x35   : > { %s5361_s4 = sld [smem:[#allocation35_spill]]  ;;  %s4004_s23 = scalar_lea.vmem %s354_s22, 1024 }
  0x36   : > { %p4005_p1 = scmp.ne.s32.totalorder %s354_s22, %s4004_s23  ;;  %p4012_p4 = scmp.lt.s32.totalorder %s354_s22, %s354_s22 }
  0x37   : > { %p4013_p9 = scmp.lt.s32.totalorder %s4004_s23, %s4004_s23 }
  0x38   : > { %p4007_p3 = pnand %p4005_p1, %p5339_p0 }
  0x39   : > { %p4014_p12 = por %p4013_p9, %p4012_p4 }
  0x3a   : > { %p4008_p7 = pneg %p4007_p3 }
  0x3b   : > { %3474 = dma.hbm_to_vmem [thread:$0]  (!%p4413_p2), %s5361_s4, 6144, %s338_s14, [#allocation9], %s4271_s25, %s4271_s25, %s4272_s13  }
  0x3c   : > { %p4015_p11 = pnand %p4014_p12, %p4008_p7 }
  0x3e   : > { %4018 = shalt.err (!%p4015_p11)
}
  0x3f   : > { %s5333_s24 = smov 64   ;;  %s5335_s26 = smov 4  }
  0x40   : > { %s5362_s6 = sld [smem:[#allocation36_spill]]  ;;  %p3504_p4 = scmp.lt.s32.totalorder %s4267_s20, 4 }
  0x41   : > { %s5332_s23 = sand.u32 1, %s4263_s19   ;;  %s4445_s16 = sshll.u32 %s4267_s20, 10 }
  0x42   : > { %s4442_s13 = sshll.u32 %s5332_s23, 6  ;;  %p4449_p8 = pnand %p3504_p4, %p4384_p5 }
  0x43   : > { %s5337_s30 = sand.u32 1, %s4267_s20   ;;  %s5364_s1 = sld [smem:[#allocation34_spill]] }
  0x44   : > { %s411_s14 = scalar_lea.vmem [#allocation5], %s4442_s13  ;;  %s4465_s27 = scalar_lea.sflag [#allocation6], %s5337_s30 }
  0x45   : > { %s418_s25 = sshll.u32 %s411_s14, 4  ;;  %p4471_p10 = pneg %p4449_p8  ;;  %s4461_s25 = int_to_ptr.vmem [resolvable:$true] %s418_s25 }
  0x46   : > { %3477 = dma.hbm_to_vmem [thread:$0]  (!%p4413_p2), %s5362_s6, 1024, %s354_s22, [#allocation12], %s5333_s24, %s5333_s24, %s5335_s26  }
  0x49   : > { %s4458_s22 = scalar_lea.hbm %s5364_s1, %s4445_s16  ;;  %s4024_s14 = scalar_lea.hbm %s5364_s1, 4096 }
  0x4a   : > { %s4019_s23 = scalar_lea.hbm %s4458_s22, 1024  ;;  %p4025_p7 = scmp.lt.s32.totalorder %s4458_s22, %s5364_s1 }
  0x4b   : > { %p4020_p5 = scmp.ne.s32.totalorder %s4458_s22, %s4019_s23  ;;  %p4026_p9 = scmp.lt.s32.totalorder %s4024_s14, %s4019_s23 }
  0x4d   : > { %p4022_p1 = pnand %p4471_p10, %p4020_p5  ;;  %p4027_p12 = por %p4026_p9, %p4025_p7 }
  0x4f   : > { %p4023_p3 = pneg %p4022_p1 }
  0x51   : > { %p4028_p11 = pnand %p4027_p12, %p4023_p3 }
  0x53   : > { %4031 = shalt.err (!%p4028_p11)
}
  0x54   : > { %s4032_s30 = scalar_lea.vmem %s4461_s25, 1024  ;;  %s4275_s11 = smov [#allocation5]  }
  0x55   : > { %p4033_p4 = scmp.ne.s32.totalorder %s4461_s25, %s4032_s30  ;;  %s4037_s10 = sshll.u32 %s4275_s11, 4  ;;  %s4038_s10 = int_to_ptr.vmem [resolvable:$false] %s4037_s10 }
  0x56   : > { %s4039_s17 = scalar_lea.vmem %s4038_s10, 2048  ;;  %p4040_p0 = scmp.lt.s32.totalorder %s4461_s25, %s4038_s10 }
  0x57   : > { %p4035_p5 = pnand %p4033_p4, %p4471_p10  ;;  %p4041_p6 = scmp.lt.s32.totalorder %s4039_s17, %s4032_s30 }
  0x59   : > { %p4036_p1 = pneg %p4035_p5  ;;  %p4042_p13 = por %p4041_p6, %p4040_p0 }
  0x5b   : > { %p4043_p2 = pnand %p4042_p13, %p4036_p1 }
  0x5d   : > { %4046 = shalt.err (!%p4043_p2)
}
  0x5e   : > { %s5366_s6 = smov 4   ;;  %s5367_s26 = smov 64  }
  0x5f   : > { %3487 = dma.hbm_to_vmem [thread:$0]  (!%p4449_p8), %s4458_s22, 1024, %s4461_s25, %s4465_s27, %s5367_s26, %s5367_s26, %s5366_s6  }
  0x60   : > { %s4276_s23 = smov [#allocation13]   ;;  %p5368_p7 = scmp.ne.s32.totalorder %s5360_s15, 0 }
  0x61   : > { %s369_s14 = sshll.u32 %s4276_s23, 4  ;;  %s370_s14 = int_to_ptr.vmem [resolvable:$true] %s369_s14 }
  0x62   : > { %s4058_s11 = scalar_lea.vmem %s370_s14, 1024  ;;  %p5369_p9 = pneg %p5368_p7 }
  0x63   : > { %p4059_p3 = scmp.ne.s32.totalorder %s370_s14, %s4058_s11  ;;  %p4066_p2 = scmp.lt.s32.totalorder %s370_s14, %s370_s14 }
  0x64   : > { %p4067_p0 = scmp.lt.s32.totalorder %s4058_s11, %s4058_s11 }
  0x65   : > { %p4061_p6 = pnand %p4059_p3, %p5369_p9 }
  0x66   : > { %p4068_p12 = por %p4067_p0, %p4066_p2 }
  0x67   : > { %p4062_p13 = pneg %p4061_p6 }
  0x69   : > { %p4069_p11 = pnand %p4068_p12, %p4062_p13 }
  0x6b   : > { %4072 = shalt.err (!%p4069_p11)
}
  0x6c   : > { %s5370_s8 = sld [smem:[#allocation37_spill]]  ;;  %s390_s15 = scalar_lea.vmem [#allocation2], %s4442_s13 }
  0x6d   : > { %s5371_s0 = sld [smem:[#allocation33_spill]]  ;;  %s397_s23 = sshll.u32 %s390_s15, 4  ;;  %s4515_s23 = int_to_ptr.vmem [resolvable:$true] %s397_s23 }
  0x6e   : > { %s5372_s11 = sand.u32 1, %s4263_s19  }
  0x6f   : > { %s387_s1 = scalar_lea.sflag [#allocation3], %s5372_s11 }
  0x72   : > { %3480 = dma.hbm_to_vmem [thread:$0]  (!%p5368_p7), %s5370_s8, 1024, %s370_s14, [#allocation12], %s5367_s26, %s5367_s26, %s5366_s6  }
  0x73   : > { %s4512_s17 = scalar_lea.hbm %s5371_s0, %s4445_s16  ;;  %s4078_s25 = scalar_lea.hbm %s5371_s0, 4096 }
  0x74   : > { %s4073_s30 = scalar_lea.hbm %s4512_s17, 1024  ;;  %p4079_p3 = scmp.lt.s32.totalorder %s4512_s17, %s5371_s0 }
  0x75   : > { %p4074_p4 = scmp.ne.s32.totalorder %s4512_s17, %s4073_s30  ;;  %p4080_p7 = scmp.lt.s32.totalorder %s4078_s25, %s4073_s30 }
  0x77   : > { %p4076_p5 = pnand %p4074_p4, %p4471_p10  ;;  %p4081_p9 = por %p4080_p7, %p4079_p3 }
  0x79   : > { %p4077_p1 = pneg %p4076_p5 }
  0x7b   : > { %p4082_p6 = pnand %p4081_p9, %p4077_p1 }
  0x7d   : > { %4085 = shalt.err (!%p4082_p6)
}
  0x7e   : > { %s4086_s15 = scalar_lea.vmem %s4515_s23, 1024  ;;  %s4277_s11 = smov [#allocation2]  }
  0x7f   : > { %p4087_p13 = scmp.ne.s32.totalorder %s4515_s23, %s4086_s15  ;;  %s4091_s14 = sshll.u32 %s4277_s11, 4  ;;  %s4092_s14 = int_to_ptr.vmem [resolvable:$false] %s4091_s14 }
  0x80   : > { %s4093_s22 = scalar_lea.vmem %s4092_s14, 2048  ;;  %p4094_p12 = scmp.lt.s32.totalorder %s4515_s23, %s4092_s14 }
  0x81   : > { %p4089_p2 = pnand %p4087_p13, %p4471_p10  ;;  %p4095_p11 = scmp.lt.s32.totalorder %s4093_s22, %s4086_s15 }
  0x83   : > { %p4090_p0 = pneg %p4089_p2  ;;  %p4096_p4 = por %p4095_p11, %p4094_p12 }
  0x85   : > { %p4097_p5 = pnand %p4096_p4, %p4090_p0 }
  0x87   : > { %4100 = shalt.err (!%p4097_p5)
}
  0x88   : > { %3484 = dma.hbm_to_vmem [thread:$0]  (!%p4449_p8), %s4512_s17, 1024, %s4515_s23, %s387_s1, %s5367_s26, %s5367_s26, %s5366_s6  }
  0x89   : > { %s4546_s25 = scalar_lea.hbm %s5315_s2, %s4445_s16  ;;  %s432_s10 = scalar_lea.vmem [#allocation7], %s4442_s13 }
  0x8a   : > { %s439_s15 = sshll.u32 %s432_s10, 4  ;;  %s4101_s11 = scalar_lea.hbm %s4546_s25, 1024  ;;  %s440_s15 = int_to_ptr.vmem [resolvable:$true] %s439_s15 }
  0x8b   : > { %p4102_p1 = scmp.ne.s32.totalorder %s4546_s25, %s4101_s11  ;;  %s4106_s1 = scalar_lea.hbm %s5315_s2, 4096 }
  0x8c   : > { %p4107_p9 = scmp.lt.s32.totalorder %s4546_s25, %s5315_s2  ;;  %p4108_p6 = scmp.lt.s32.totalorder %s4106_s1, %s4101_s11 }
  0x8d   : > { %p4104_p3 = pnand %p4102_p1, %p4471_p10 }
  0x8e   : > { %p4109_p13 = por %p4108_p6, %p4107_p9 }
  0x8f   : > { %p4105_p7 = pneg %p4104_p3 }
  0x91   : > { %p4110_p2 = pnand %p4109_p13, %p4105_p7 }
  0x93   : > { %4113 = shalt.err (!%p4110_p2)
}
  0x94   : > { %s4114_s8 = scalar_lea.vmem %s440_s15, 1024  ;;  %s4278_s30 = smov [#allocation7]  }
  0x95   : > { %p4115_p0 = scmp.ne.s32.totalorder %s440_s15, %s4114_s8  ;;  %s4119_s10 = sshll.u32 %s4278_s30, 4  ;;  %s4120_s10 = int_to_ptr.vmem [resolvable:$false] %s4119_s10 }
  0x96   : > { %s4121_s0 = scalar_lea.vmem %s4120_s10, 2048  ;;  %p4122_p4 = scmp.lt.s32.totalorder %s440_s15, %s4120_s10 }
  0x97   : > { %p4117_p12 = pnand %p4115_p0, %p4471_p10  ;;  %p4123_p5 = scmp.lt.s32.totalorder %s4121_s0, %s4114_s8 }
  0x99   : > { %p4118_p11 = pneg %p4117_p12  ;;  %p4124_p1 = por %p4123_p5, %p4122_p4 }
  0x9b   : > { %p4125_p3 = pnand %p4124_p1, %p4118_p11 }
  0x9d   : > { %4128 = shalt.err (!%p4125_p3)
}
  0x9e   : > { %3490 = dma.hbm_to_vmem [thread:$0]  (!%p4449_p8), %s4546_s25, 1024, %s440_s15, %s4465_s27, %s5367_s26, %s5367_s26, %s5366_s6  }
  0x9f   : > { %s4573_s22 = scalar_lea.hbm %s5316_s3, %s4445_s16  ;;  %s453_s0 = scalar_lea.vmem [#allocation8], %s4442_s13 }
  0xa0   : > { %s460_s1 = sshll.u32 %s453_s0, 4  ;;  %s5373_s17 = sand.u32 1, %s4267_s20   ;;  %s4576_s1 = int_to_ptr.vmem [resolvable:$true] %s460_s1 }
  0xa1   : > { %s450_s23 = scalar_lea.sflag [#allocation9], %s5373_s17  ;;  %s4129_s8 = scalar_lea.hbm %s4573_s22, 1024 }
  0xa2   : > { %p4130_p7 = scmp.ne.s32.totalorder %s4573_s22, %s4129_s8  ;;  %s4134_s15 = scalar_lea.hbm %s5316_s3, 4096 }
  0xa3   : > { %p4135_p13 = scmp.lt.s32.totalorder %s4573_s22, %s5316_s3  ;;  %p4136_p2 = scmp.lt.s32.totalorder %s4134_s15, %s4129_s8 }
  0xa4   : > { %p4132_p9 = pnand %p4130_p7, %p4471_p10 }
  0xa5   : > { %p4137_p0 = por %p4136_p2, %p4135_p13 }
  0xa6   : > { %p4133_p6 = pneg %p4132_p9 }
  0xa8   : > { %p4138_p12 = pnand %p4137_p0, %p4133_p6 }
  0xaa   : > { %4141 = shalt.err (!%p4138_p12)
}
  0xab   : > { %s4142_s13 = scalar_lea.vmem %s4576_s1, 1024  ;;  %s4279_s10 = smov [#allocation8]  }
  0xac   : > { %p4143_p11 = scmp.ne.s32.totalorder %s4576_s1, %s4142_s13  ;;  %s4147_s11 = sshll.u32 %s4279_s10, 4  ;;  %s4148_s11 = int_to_ptr.vmem [resolvable:$false] %s4147_s11 }
  0xad   : > { %s4149_s14 = scalar_lea.vmem %s4148_s11, 2048  ;;  %p4150_p1 = scmp.lt.s32.totalorder %s4576_s1, %s4148_s11 }
  0xae   : > { %p4145_p4 = pnand %p4143_p11, %p4471_p10  ;;  %p4151_p3 = scmp.lt.s32.totalorder %s4149_s14, %s4142_s13 }
  0xb0   : > { %p4146_p5 = pneg %p4145_p4  ;;  %p4152_p7 = por %p4151_p3, %p4150_p1 }
  0xb2   : > { %p4153_p9 = pnand %p4152_p7, %p4146_p5 }
  0xb4   : > { %4156 = shalt.err (!%p4153_p9)
}
  0xb5   : > { %3493 = dma.hbm_to_vmem [thread:$0]  (!%p4449_p8), %s4573_s22, 1024, %s4576_s1, %s450_s23, %s5367_s26, %s5367_s26, %s5366_s6  }
  0xb6   : > { %p5374_p10 = scmp.ne.s32.totalorder %s5359_s12, 0 }
  0xb8   : > { %472 = sbr.rel (%p5374_p10) target bundleno = 700 (0x2bc), region = 60 }
  0xbd   : > { %s4606_s24 = sand.u32 1, %s4259_s18   ;;  %p5375_p6 = scmp.ne.s32.totalorder %s5355_s28, 0 }
  0xbe   : > { %s4609_s0 = sshll.u32 %s4606_s24, 6  ;;  %s475_s17 = scalar_lea.sflag [#allocation3], %s4606_s24 }
  0xbf   : > { %s4613_s4 = scalar_lea.vmem [#allocation2], %s4609_s0 }
  0xc0   : > { %4226 = dma.done.wait (%p5375_p6), %s475_s17, 1024  }
  0xc1   : > { %4228 = vsyncadd (%p5375_p6), %s475_s17, 4294966272  ;;  %s483_s12 = sand.u32 1, %s4366_s21   ;;  %s4621_s26 = scalar_lea.vmem [#allocation5], %s4609_s0 }
  0xc2   : > { %s484_s6 = scalar_lea.sflag [#allocation6], %s483_s12 }
  0xc3   : > { %4230 = dma.done.wait (%p5375_p6), %s484_s6, 2048  }
  0xc4   : > { %4232 = vsyncadd (%p5375_p6), %s484_s6, 4294965248  ;;  %s4628_s22 = scalar_lea.vmem [#allocation7], %s4609_s0  ;;  %s502_s1 = scalar_lea.sflag [#allocation9], %s483_s12 }
  0xc5   : > { %s4631_s23 = scalar_lea.vmem [#allocation8], %s4609_s0 }
  0xc6   : > { %4234 = dma.done.wait (%p5375_p6), %s502_s1, 1024  }
  0xc7   : > { %4236 = vsyncadd (%p5375_p6), %s502_s1, 4294966272  ;;  %p5376_p8 = scmp.eq.s32.totalorder %s4366_s21, 0 }
  0xc9   : > { %4238 = dma.done.wait (%p5376_p8), [#allocation9], 6144   ;;  %p5377_p13 = pmov %p5376_p8 }
  0xca   : > { %p5378_p2 = pmov %p5376_p8 }
  0xcb   : > { %4240 = vsyncadd (%p5377_p13), [#allocation9], 4294961152 }
  0xcc   : > { %4242 = dma.done.wait (%p5378_p2), [#allocation12], 2048   ;;  %p5379_p0 = pmov %p5378_p2 }
  0xcd   : > { %v4280_v0 = vmov 0   ;;  %v3551_v1 = vld [vmem:[#allocation10 + $0x16c] ss:$12 sps:$4 sm:$0xff]   ;;  %v3553_v2 = vld [vmem:[#allocation10 + $0x170] ss:$12 sps:$4 sm:$0xff]   ;;  %v4647_v18 = vld [vmem:[%s4621_s26] sm:$0xff]  }
  0xce   : > { %4244 = vsyncadd (%p5379_p0), [#allocation12], 4294965248  ;;  %887 = vmatprep.mubr.bf16.mxu0 %v4280_v0  ;;  %855 = vmatprep.subr.bf16.mxu0 %v3551_v1  ;;  %v3554_v3 = vld [vmem:[#allocation10 + $0x168] ss:$12 sps:$4 sm:$0xff]   ;;  %v3557_v5 = vld [vmem:[#allocation10 + $0x158] ss:$12 sps:$4 sm:$0xff]  }
  0xcf   : > { %3319 = vmatprep.subr.bf16.mxu1 %v3553_v2  ;;  %v3555_v4 = vld [vmem:[#allocation10 + $0x154] ss:$12 sps:$4 sm:$0xff]   ;;  %856 = vmatpush1.bf16.msra.mxu0 %v3554_v3  ;;  %v3558_v6 = vld [vmem:[#allocation10 + $0x150] ss:$12 sps:$4 sm:$0xff]   ;;  %v3562_v9 = vld [vmem:[#allocation10 + $0x138] ss:$12 sps:$4 sm:$0xff]  }
  0xd0   : > { %3320 = vmatpush3.bf16.msra.mxu1 %v3553_v2  ;;  %857 = vmatprep.subr.bf16.mxu0 %v3555_v4  ;;  %v3559_v7 = vld [vmem:[#allocation10 + $0x13c] ss:$12 sps:$4 sm:$0xff]   ;;  %v3561_v8 = vld [vmem:[#allocation10 + $0x140] ss:$12 sps:$4 sm:$0xff]   ;;  %v3563_v10 = vld [vmem:[#allocation10 + $0x124] ss:$12 sps:$4 sm:$0xff]  }
  0xd1   : > { %3321 = vmatprep.subr.bf16.mxu1 %v3557_v5  ;;  %v3565_v11 = vld [vmem:[#allocation10 + $0x128] ss:$12 sps:$4 sm:$0xff]   ;;  %v3566_v12 = vld [vmem:[#allocation10 + $0x120] ss:$12 sps:$4 sm:$0xff]   ;;  %v3569_v14 = vld [vmem:[#allocation10 + $0x110] ss:$12 sps:$4 sm:$0xff]   ;;  %3335 = vmatprep.mubr.bf16.mxu1 %v4647_v18 }
  0xd2   : > { %v3567_v13 = vld [vmem:[#allocation10 + $0x10c] ss:$12 sps:$4 sm:$0xff]   ;;  %v3570_v15 = vld [vmem:[#allocation10 + $0x108] ss:$12 sps:$4 sm:$0xff]   ;;  %v3574_v19 = vld [vmem:[#allocation10 + $0xf0] ss:$12 sps:$4 sm:$0xff]  }
  0xd3   : > { %858 = vmatpush1.bf16.msra.mxu0 %v3558_v6  ;;  %v3571_v16 = vld [vmem:[#allocation10 + $0xf4] ss:$12 sps:$4 sm:$0xff]   ;;  %v3573_v17 = vld [vmem:[#allocation10 + $0xf8] ss:$12 sps:$4 sm:$0xff]   ;;  %v3575_v20 = vld [vmem:[#allocation10 + $0xdc] ss:$12 sps:$4 sm:$0xff]  }
  0xd4   : > { %3322 = vmatpush3.bf16.msra.mxu1 %v3557_v5  ;;  %859 = vmatprep.subr.bf16.mxu0 %v3559_v7  ;;  %v3577_v21 = vld [vmem:[#allocation10 + $0xe0] ss:$12 sps:$4 sm:$0xff]   ;;  %v3578_v22 = vld [vmem:[#allocation10 + $0xd8] ss:$12 sps:$4 sm:$0xff]   ;;  %v3581_v24 = vld [vmem:[#allocation10 + $0xc8] ss:$12 sps:$4 sm:$0xff]  }
  0xd5   : > { %3323 = vmatprep.subr.bf16.mxu1 %v3561_v8  ;;  %v3579_v23 = vld [vmem:[#allocation10 + $0xc4] ss:$12 sps:$4 sm:$0xff]   ;;  %v3582_v25 = vld [vmem:[#allocation10 + $0xc0] ss:$12 sps:$4 sm:$0xff]   ;;  %v3585_v29 = vld [vmem:[#allocation10 + $0xa8] ss:$12 sps:$4 sm:$0xff]  }
  0xd6   : > { %v3587_v26 = vld [vmem:[#allocation10 + $0xac] ss:$12 sps:$4 sm:$0xff]   ;;  %v3588_v27 = vld [vmem:[#allocation10 + $0xb0] ss:$12 sps:$4 sm:$0xff]   ;;  %v3591_v30 = vld [vmem:[#allocation10 + $0x94] ss:$12 sps:$4 sm:$0xff]  }
  0xd7   : > { %860 = vmatpush1.bf16.msra.mxu0 %v3562_v9  ;;  %v4651_v28 = vld [vmem:[%s4621_s26 + $0x8] sm:$0xff]   ;;  %v4654_v31 = vld [vmem:[%s4621_s26 + $0x10] sm:$0xff]   ;;  %v3597_v32 = vld [vmem:[#allocation10 + $0x98] ss:$12 sps:$4 sm:$0xff]   ;;  %s5107_s30 = scalar_lea.vmem [#allocation15], %s4609_s0  ;;  %s5151_s13 = scalar_lea.vmem [#allocation14], %s4609_s0 }
  0xd8   : > { %3324 = vmatpush3.bf16.msra.mxu1 %v3561_v8  ;;  %861 = vmatprep.subr.bf16.mxu0 %v3563_v10  ;;  %v3589_v33 = vld [vmem:[#allocation10 + $0x90] ss:$12 sps:$4 sm:$0xff]   ;;  %v3606_v35 = vld [vmem:[#allocation10 + $0x80] ss:$12 sps:$4 sm:$0xff]   ;;  %v3594_v37 = vld [vmem:[#allocation10 + $0x78] ss:$12 sps:$4 sm:$0xff]  }
  0xd9   : > { %3325 = vmatprep.subr.bf16.mxu1 %v3565_v11  ;;  %v3596_v34 = vld [vmem:[#allocation10 + $0x7c] ss:$12 sps:$4 sm:$0xff]   ;;  %v3600_v38 = vld [vmem:[#allocation10 + $0x64] ss:$12 sps:$4 sm:$0xff]   ;;  %v3598_v41 = vld [vmem:[#allocation10 + $0x60] ss:$12 sps:$4 sm:$0xff]  }
  0xda   : > { %v4661_v36 = vld [vmem:[%s4621_s26 + $0x18] sm:$0xff]   ;;  %v4664_v39 = vld [vmem:[%s4621_s26 + $0x20] sm:$0xff]   ;;  %v3615_v40 = vld [vmem:[#allocation10 + $0x68] ss:$12 sps:$4 sm:$0xff]   ;;  %s3081_s10 = sshll.u32 %s4366_s21, 10  ;;  %s2634_s11 = sshll.u32 %s5107_s30, 4  ;;  %s5230_s11 = int_to_ptr.vmem [resolvable:$true] %s2634_s11 }
  0xdb   : > { %862 = vmatpush1.bf16.msra.mxu0 %v3566_v12  ;;  %v3605_v42 = vld [vmem:[#allocation10 + $0x4c] ss:$12 sps:$4 sm:$0xff]   ;;  %v3603_v44 = vld [vmem:[#allocation10 + $0x48] ss:$12 sps:$4 sm:$0xff]   ;;  %v3620_v47 = vld [vmem:[#allocation10 + $0x50] ss:$12 sps:$4 sm:$0xff]  }
  0xdc   : > { %3326 = vmatpush3.bf16.msra.mxu1 %v3565_v11  ;;  %863 = vmatprep.subr.bf16.mxu0 %v3567_v13  ;;  %v4671_v43 = vld [vmem:[%s4621_s26 + $0x28] sm:$0xff]   ;;  %v3609_v45 = vld [vmem:[#allocation10 + $0x34] ss:$12 sps:$4 sm:$0xff]   ;;  %v3607_v48 = vld [vmem:[#allocation10 + $0x30] ss:$12 sps:$4 sm:$0xff]   ;;  %s5390_s17 = sld [smem:[#allocation39_spill]] }
  0xdd   : > { %3327 = vmatprep.subr.bf16.mxu1 %v3569_v14  ;;  %v4674_v46 = vld [vmem:[%s4621_s26 + $0x30] sm:$0xff]   ;;  %v3623_v49 = vld [vmem:[#allocation10 + $0x38] ss:$12 sps:$4 sm:$0xff]   ;;  %v3614_v50 = vld [vmem:[#allocation10 + $0x1c] ss:$12 sps:$4 sm:$0xff]   ;;  %s2605_s6 = scalar_lea.sflag [#allocation16], %s4606_s24 }
  0xde   : > { %v4681_v51 = vld [vmem:[%s4621_s26 + $0x38] sm:$0xff]   ;;  %v3618_v53 = vld [vmem:[#allocation10 + $0x4] ss:$12 sps:$4 sm:$0xff]   ;;  %v3626_v54 = vld [vmem:[#allocation10 + $0x20] ss:$12 sps:$4 sm:$0xff]   ;;  %s4157_s26 = scalar_lea.vmem %s5230_s11, 1024 }
  0xdf   : > { %864 = vmatpush1.bf16.msra.mxu0 %v3570_v15  ;;  %v3612_v52 = vld [vmem:[#allocation10 + $0x18] ss:$12 sps:$4 sm:$0xff]   ;;  %v3616_v55 = vld [vmem:[#allocation10] ss:$12 sps:$4 sm:$0xff]   ;;  %v3624_v58 = vld [vmem:[#allocation13 + $0x30] sm:$0xff]   ;;  %p4158_p12 = scmp.ne.s32.totalorder %s5230_s11, %s4157_s26  ;;  %p5392_p11 = scmp.ne.s32.totalorder %s5356_s29, 0 }
  0xe0   : > { %3328 = vmatpush3.bf16.msra.mxu1 %v3569_v14  ;;  %865 = vmatprep.subr.bf16.mxu0 %v3571_v16  ;;  %v3621_v56 = vld [vmem:[#allocation13 + $0x38] sm:$0xff]   ;;  %v4688_v57 = vld [vmem:[%s4613_s4] sm:$0xff]   ;;  %v3629_v59 = vld [vmem:[#allocation10 + $0x8] ss:$12 sps:$4 sm:$0xff]  }
  0xe1   : > { %3329 = vmatprep.subr.bf16.mxu1 %v3573_v17  ;;  %v3632_v60 = vld [vmem:[#allocation11 + $0x38] sm:$0xff]   ;;  %v3627_v61 = vld [vmem:[#allocation13 + $0x28] sm:$0xff]   ;;  %v3630_v63 = vld [vmem:[#allocation13 + $0x20] sm:$0xff]   ;;  %p4159_p4 = pnand %p4158_p12, %p5392_p11 }
  0xe2   : > { %v4695_v62 = vld [vmem:[%s4613_s4 + $0x8] sm:$0xff]   ;;  %v3633_v1 = vld [vmem:[#allocation13 + $0x18] sm:$0xff]   ;;  %v4702_v2 = vld [vmem:[%s4613_s4 + $0x10] sm:$0xff]   ;;  %s5228_s12 = scalar_lea.hbm %s5390_s17, %s3081_s10 }
  0xe3   : > { %866 = vmatpush1.bf16.msra.mxu0 %v3574_v19  ;;  %v3637_v3 = vld [vmem:[#allocation13 + $0x10] sm:$0xff]   ;;  %v3641_v4 = vld [vmem:[#allocation13 + $0x8] sm:$0xff]   ;;  %v3628_v5 = vld [vmem:[%s4613_s4 + $0x18] sm:$0xff]   ;;  %p4160_p5 = pneg %p4159_p4 }
  0xe4   : > { %3330 = vmatpush3.bf16.msra.mxu1 %v3573_v17  ;;  %867 = vmatprep.subr.bf16.mxu0 %v3575_v20  ;;  %v3645_v6 = vld [vmem:[#allocation13] sm:$0xff]   ;;  %v3634_v8 = vld [vmem:[#allocation11 + $0x30] sm:$0xff]   ;;  %v3636_v9 = vld [vmem:[#allocation11 + $0x28] sm:$0xff]  }
  0xe5   : > { %3331 = vmatprep.subr.bf16.mxu1 %v3577_v21  ;;  %v3631_v7 = vld [vmem:[%s4613_s4 + $0x20] sm:$0xff]   ;;  %v3635_v10 = vld [vmem:[%s4613_s4 + $0x28] sm:$0xff]   ;;  %v3640_v12 = vld [vmem:[#allocation11 + $0x18] sm:$0xff]  }
  0xe6   : > { %v3638_v11 = vld [vmem:[#allocation11 + $0x20] sm:$0xff]   ;;  %v3639_v13 = vld [vmem:[%s4613_s4 + $0x30] sm:$0xff]   ;;  %v3644_v15 = vld [vmem:[#allocation11 + $0x8] sm:$0xff]  }
  0xe7   : > { %868 = vmatpush1.bf16.msra.mxu0 %v3578_v22  ;;  %v3642_v14 = vld [vmem:[#allocation11 + $0x10] sm:$0xff]   ;;  %v3643_v16 = vld [vmem:[%s4613_s4 + $0x38] sm:$0xff]   ;;  %v3646_v17 = vld [vmem:[#allocation11] sm:$0xff]   ;;  %s5391_s4 = smov %s5390_s17 }
  0xe8   : > { %3332 = vmatpush3.bf16.msra.mxu1 %v3577_v21  ;;  %869 = vmatprep.subr.bf16.mxu0 %v3579_v23 }
  0xe9   : > { %3333 = vmatprep.subr.bf16.mxu1 %v3581_v24 }
  0xeb   : > { %870 = vmatpush1.bf16.msra.mxu0 %v3582_v25 }
  0xec   : > { %3334 = vmatpush3.bf16.msra.mxu1 %v3581_v24  ;;  %3351 = vmatprep.subr.bf16.mxu0 %v3588_v27 }
  0xed   : > { %1241 = vmatprep.subr.bf16.mxu1 %v3587_v26 }
  0xee   : > { %888 = vmatmul.mubr.bf16.vlgmr.msra.gmra.mxu0 %v4647_v18 }
  0xef   : > { %3336 = vmatmul.mubr.bf16.vlgmr.msra.gmra.mxu1 %v4651_v28  ;;  %3352 = vmatpush3.bf16.msra.mxu0 %v3588_v27 }
  0xf0   : > { %1242 = vmatpush1.bf16.msra.mxu1 %v3585_v29  ;;  %897 = vmatprep.mubr.bf16.mxu0 %v4280_v0 }
  0xf1   : > { %1243 = vmatprep.subr.bf16.mxu1 %v3591_v30  ;;  %3339 = vmatprep.mubr.bf16.mxu1 %v4654_v31 }
  0xf2   : > { %3353 = vmatprep.subr.bf16.mxu0 %v3597_v32 }
  0xf3   : > { %3354 = vmatpush3.bf16.msra.mxu0 %v3597_v32 }
  0xf4   : > { %1244 = vmatpush1.bf16.msra.mxu1 %v3589_v33  ;;  %3355 = vmatprep.subr.bf16.mxu0 %v3606_v35  ;;  %v1454_v33 = vlaneseq }
  0xf5   : > { %1245 = vmatprep.subr.bf16.mxu1 %v3596_v34 }
  0xf6   : > { %898 = vmatmul.mubr.bf16.gmra.mxu0 %v4651_v28 }
  0xf7   : > { %3340 = vmatmul.mubr.bf16.gmra.mxu1 %v4661_v36  ;;  %907 = vmatprep.mubr.bf16.mxu0 %v4280_v0 }
  0xf8   : > { %1246 = vmatpush1.bf16.msra.mxu1 %v3594_v37  ;;  %3343 = vmatprep.mubr.bf16.mxu1 %v4664_v39 }
  0xf9   : > { %1247 = vmatprep.subr.bf16.mxu1 %v3600_v38  ;;  %3356 = vmatpush3.bf16.msra.mxu0 %v3606_v35  ;;  %v4754_v38 = vshrl.u32 %v1454_v33, 7 }
  0xfa   : > { %3357 = vmatprep.subr.bf16.mxu0 %v3615_v40 }
  0xfc   : > { %1248 = vmatpush1.bf16.msra.mxu1 %v3598_v41  ;;  %v1451_v41 = vld [vmem:[%s5318_s5] sm:$0x7] }
  0xfd   : > { %1249 = vmatprep.subr.bf16.mxu1 %v3605_v42  ;;  %3358 = vmatpush3.bf16.msra.mxu0 %v3615_v40 }
  0xfe   : > { %908 = vmatmul.mubr.bf16.gmra.mxu0 %v4654_v31  ;;  %3359 = vmatprep.subr.bf16.mxu0 %v3620_v47 }
  0xff   : > { %3344 = vmatmul.mubr.bf16.gmra.mxu1 %v4671_v43  ;;  %917 = vmatprep.mubr.bf16.mxu0 %v4280_v0 }
 0x100   : > { %1250 = vmatpush1.bf16.msra.mxu1 %v3603_v44  ;;  %3347 = vmatprep.mubr.bf16.mxu1 %v4674_v46  ;;  %v4767_v44 = vunpack.c.l.bf16 %v1451_v41 }
 0x101   : > { %1251 = vmatprep.subr.bf16.mxu1 %v3609_v45  ;;  %3360 = vmatpush3.bf16.msra.mxu0 %v3620_v47  ;;  %v4770_v45 = vsub.s32 0, %v4754_v38 }
 0x102   : > { %3361 = vmatprep.subr.bf16.mxu0 %v3623_v49 }
 0x104   : > { %1252 = vmatpush1.bf16.msra.mxu1 %v3607_v48 }
 0x105   : > { %1253 = vmatprep.subr.bf16.mxu1 %v3614_v50  ;;  %3362 = vmatpush3.bf16.msra.mxu0 %v3623_v49  ;;  %v1457_v50 = vrot.slane %v4767_v44, %v4770_v45 }
 0x106   : > { %918 = vmatmul.mubr.bf16.gmra.mxu0 %v4661_v36  ;;  %3363 = vmatprep.subr.bf16.mxu0 %v3626_v54 }
 0x107   : > { %3348 = vmatmul.mubr.bf16.gmra.mxu1 %v4681_v51  ;;  %927 = vmatprep.mubr.bf16.mxu0 %v4280_v0 }
 0x108   : > { %1254 = vmatpush1.bf16.msra.mxu1 %v3612_v52  ;;  %1273 = vmatprep.mubr.bf16.mxu1 %v4280_v0 }
 0x109   : > { %1255 = vmatprep.subr.bf16.mxu1 %v3618_v53  ;;  %3364 = vmatpush3.bf16.msra.mxu0 %v3626_v54 }
 0x10a   : > { %3365 = vmatprep.subr.bf16.mxu0 %v3629_v59 }
 0x10c   : > { %1256 = vmatpush1.bf16.msra.mxu1 %v3616_v55  ;;  %v4791_v55 = vrot.slane %v1457_v50, %v4770_v45 }
 0x10d   : > { %3415 = vmatprep.subr.bf16.mxu1 %v3621_v56  ;;  %3366 = vmatpush3.bf16.msra.mxu0 %v3629_v59 }
 0x10e   : > { %928 = vmatmul.mubr.bf16.gmra.mxu0 %v4664_v39  ;;  %3383 = vmatprep.subr.bf16.mxu0 %v3632_v60 }
 0x10f   : > { %1274 = vmatmul.mubr.bf16.vlgmr.msra.gmra.mxu1 %v4688_v57  ;;  %937 = vmatprep.mubr.bf16.mxu0 %v4280_v0 }
 0x110   : > { %3416 = vmatpush3.bf16.msra.mxu1 %v3621_v56  ;;  %1283 = vmatprep.mubr.bf16.mxu1 %v4280_v0 }
 0x111   : > { %3417 = vmatprep.subr.bf16.mxu1 %v3624_v58 }
 0x114   : > { %3418 = vmatpush3.bf16.msra.mxu1 %v3624_v58 }
 0x115   : > { %3419 = vmatprep.subr.bf16.mxu1 %v3627_v61 }
 0x116   : > { %938 = vmatmul.mubr.bf16.gmra.mxu0 %v4671_v43 }
 0x117   : > { %1284 = vmatmul.mubr.bf16.gmra.mxu1 %v4695_v62  ;;  %947 = vmatprep.mubr.bf16.mxu0 %v4280_v0 }
 0x118   : > { %1293 = vmatprep.mubr.bf16.mxu1 %v4280_v0  ;;  %3420 = vmatpush3.bf16.msra.mxu1 %v3627_v61 }
 0x119   : > { %3421 = vmatprep.subr.bf16.mxu1 %v3630_v63 }
 0x11c   : > { %3422 = vmatpush3.bf16.msra.mxu1 %v3630_v63 }
 0x11d   : > { %3423 = vmatprep.subr.bf16.mxu1 %v3633_v1 }
 0x11e   : > { %948 = vmatmul.mubr.bf16.gmra.mxu0 %v4674_v46 }
 0x11f   : > { %1294 = vmatmul.mubr.bf16.gmra.mxu1 %v4702_v2  ;;  %957 = vmatprep.mubr.bf16.mxu0 %v4280_v0 }
 0x120   : > { %1303 = vmatprep.mubr.bf16.mxu1 %v4280_v0  ;;  %3424 = vmatpush3.bf16.msra.mxu1 %v3633_v1 }
 0x121   : > { %3425 = vmatprep.subr.bf16.mxu1 %v3637_v3 }
 0x124   : > { %3426 = vmatpush3.bf16.msra.mxu1 %v3637_v3 }
 0x125   : > { %3427 = vmatprep.subr.bf16.mxu1 %v3641_v4 }
 0x126   : > { %958 = vmatmul.mubr.bf16.gmra.mxu0 %v4681_v51 }
 0x127   : > { %1304 = vmatmul.mubr.bf16.gmra.mxu1 %v3628_v5  ;;  %3367 = vmatprep.mubr.bf16.mxu0 %v4688_v57 }
 0x128   : > { %1313 = vmatprep.mubr.bf16.mxu1 %v4280_v0  ;;  %3428 = vmatpush3.bf16.msra.mxu1 %v3641_v4  ;;  %v1460_v4 = vsub.s32 2, %v4754_v38 }
 0x129   : > { %3429 = vmatprep.subr.bf16.mxu1 %v3645_v6 }
 0x12c   : > { %3430 = vmatpush3.bf16.msra.mxu1 %v3645_v6 }
 0x12e   : > { %3368 = vmatmul.mubr.bf16.vlgmr.msra.gmra.mxu0 %v4695_v62 }
 0x12f   : > { %1314 = vmatmul.mubr.bf16.gmra.mxu1 %v3631_v7  ;;  %3384 = vmatpush3.bf16.msra.mxu0 %v3632_v60 }
 0x130   : > { %1323 = vmatprep.mubr.bf16.mxu1 %v4280_v0  ;;  %3385 = vmatprep.subr.bf16.mxu0 %v3634_v8 }
 0x131   : > { %3371 = vmatprep.mubr.bf16.mxu0 %v4702_v2 }
 0x133   : > { %3386 = vmatpush3.bf16.msra.mxu0 %v3634_v8 }
 0x134   : > { %3387 = vmatprep.subr.bf16.mxu0 %v3636_v9 }
 0x136   : > { %3372 = vmatmul.mubr.bf16.gmra.mxu0 %v3628_v5 }
 0x137   : > { %1324 = vmatmul.mubr.bf16.gmra.mxu1 %v3635_v10  ;;  %3388 = vmatpush3.bf16.msra.mxu0 %v3636_v9 }
 0x138   : > { %1333 = vmatprep.mubr.bf16.mxu1 %v4280_v0  ;;  %3389 = vmatprep.subr.bf16.mxu0 %v3638_v11 }
 0x139   : > { %3375 = vmatprep.mubr.bf16.mxu0 %v3631_v7 }
 0x13b   : > { %3390 = vmatpush3.bf16.msra.mxu0 %v3638_v11 }
 0x13c   : > { %3391 = vmatprep.subr.bf16.mxu0 %v3640_v12 }
 0x13e   : > { %3376 = vmatmul.mubr.bf16.gmra.mxu0 %v3635_v10 }
 0x13f   : > { %1334 = vmatmul.mubr.bf16.gmra.mxu1 %v3639_v13  ;;  %3392 = vmatpush3.bf16.msra.mxu0 %v3640_v12 }
 0x140   : > { %1343 = vmatprep.mubr.bf16.mxu1 %v4280_v0  ;;  %3393 = vmatprep.subr.bf16.mxu0 %v3642_v14 }
 0x141   : > { %3379 = vmatprep.mubr.bf16.mxu0 %v3639_v13 }
 0x143   : > { %3394 = vmatpush3.bf16.msra.mxu0 %v3642_v14 }
 0x144   : > { %3395 = vmatprep.subr.bf16.mxu0 %v3644_v15 }
 0x146   : > { %3380 = vmatmul.mubr.bf16.gmra.mxu0 %v3643_v16 }
 0x147   : > { %1344 = vmatmul.mubr.bf16.gmra.mxu1 %v3643_v16  ;;  %3396 = vmatpush3.bf16.msra.mxu0 %v3644_v15 }
 0x148   : > { %3399 = vmatprep.mubr.bf16.mxu0 %v4688_v57  ;;  %3397 = vmatprep.subr.bf16.mxu0 %v3646_v17 }
 0x149   : > { %3431 = vmatprep.mubr.bf16.mxu1 %v4647_v18 }
 0x14b   : > { %3398 = vmatpush3.bf16.msra.mxu0 %v3646_v17 }
 0x14e   : > { %3400 = vmatmul.mubr.bf16.vlgmr.msra.gmra.mxu0 %v4695_v62 }
 0x14f   : > { %3432 = vmatmul.mubr.bf16.vlgmr.msra.gmra.mxu1 %v4651_v28  ;;  %3403 = vmatprep.mubr.bf16.mxu0 %v4702_v2 }
 0x150   : > { %3435 = vmatprep.mubr.bf16.mxu1 %v4654_v31 }
 0x156   : > { %3404 = vmatmul.mubr.bf16.gmra.mxu0 %v3628_v5 }
 0x157   : > { %3436 = vmatmul.mubr.bf16.gmra.mxu1 %v4661_v36  ;;  %3407 = vmatprep.mubr.bf16.mxu0 %v3631_v7 }
 0x158   : > { %3439 = vmatprep.mubr.bf16.mxu1 %v4664_v39 }
 0x15e   : > { %3408 = vmatmul.mubr.bf16.gmra.mxu0 %v3635_v10 }
 0x15f   : > { %3440 = vmatmul.mubr.bf16.gmra.mxu1 %v4671_v43  ;;  %3411 = vmatprep.mubr.bf16.mxu0 %v3639_v13  ;;  %v1461_v13 = vrot.slane %v4767_v44, %v1460_v4 }
 0x160   : > { %3443 = vmatprep.mubr.bf16.mxu1 %v4674_v46 }
 0x166   : > { %3412 = vmatmul.mubr.bf16.gmra.mxu0 %v3643_v16 }
 0x167   : > { %3444 = vmatmul.mubr.bf16.gmra.mxu1 %v4681_v51 }
 0x1ae   : > { %v889_v0 = vpop.f32.mrf.mxu0 }
 0x1af   : > { %v4732_v18 = vpop.f32.mrf.mxu1 }
 0x1b0   : > { %v891_v19 = vpop.f32.mrf.mxu0 }
 0x1b1   : > { %v4734_v20 = vpop.f32.mrf.mxu1 }
 0x1b2   : > { %v893_v21 = vpop.f32.mrf.mxu0 }
 0x1b3   : > { %v4736_v22 = vpop.f32.mrf.mxu1 }
 0x1b4   : > { %v895_v23 = vpop.f32.mrf.mxu0 }
 0x1b5   : > { %v4738_v24 = vpop.f32.mrf.mxu1 }
 0x1b6   : > { %v899_v25 = vpop.f32.mrf.mxu0 }
 0x1b7   : > { %v4740_v26 = vpop.f32.mrf.mxu1 }
 0x1b8   : > { %v901_v27 = vpop.f32.mrf.mxu0 }
 0x1b9   : > { %v4742_v28 = vpop.f32.mrf.mxu1 }
 0x1ba   : > { %v903_v29 = vpop.f32.mrf.mxu0 }
 0x1bb   : > { %v4744_v30 = vpop.f32.mrf.mxu1 }
 0x1bc   : > { %v905_v31 = vpop.f32.mrf.mxu0 }
 0x1bd   : > { %v4746_v32 = vpop.f32.mrf.mxu1 }
 0x1be   : > { %v909_v34 = vpop.f32.mrf.mxu0 }
 0x1bf   : > { %v4748_v35 = vpop.f32.mrf.mxu1 }
 0x1c0   : > { %v4750_v36 = vpop.f32.mrf.mxu0 }
 0x1c1   : > { %v4752_v37 = vpop.f32.mrf.mxu1 }
 0x1c2   : > { %v4756_v39 = vpop.f32.mrf.mxu0 }
 0x1c3   : > { %v4758_v40 = vpop.f32.mrf.mxu1 }
 0x1c4   : > { %v4763_v42 = vpop.f32.mrf.mxu0 }
 0x1c5   : > { %v4765_v43 = vpop.f32.mrf.mxu1 }
 0x1c6   : > { %v4772_v46 = vpop.f32.mrf.mxu0 }
 0x1c7   : > { %v4774_v47 = vpop.f32.mrf.mxu1 }
 0x1c8   : > { %v4776_v48 = vpop.f32.mrf.mxu0 }
 0x1c9   : > { %v4778_v49 = vpop.f32.mrf.mxu1 }
 0x1ca   : > { %v4782_v51 = vpop.f32.mrf.mxu0 }
 0x1cb   : > { %v4784_v52 = vpop.f32.mrf.mxu1 }
 0x1cc   : > { %v4786_v53 = vpop.f32.mrf.mxu0 }
 0x1cd   : > { %v4788_v54 = vpop.f32.mrf.mxu1 }
 0x1ce   : > { %v4793_v56 = vpop.f32.mrf.mxu0 }
 0x1cf   : > { %v1275_v57 = vpop.f32.mrf.mxu1 }
 0x1d0   : > { %v1276_v58 = vadd.f32 %v1275_v57, %v889_v0  ;;  %v4795_v59 = vpop.f32.mrf.mxu0 }
 0x1d1   : > { %v1277_v60 = vpop.f32.mrf.mxu1 }
 0x1d2   : > { %v1481_v61 = vadd.f32 %v4791_v55, %v1276_v58  ;;  %v1278_v62 = vadd.f32 %v1277_v60, %v891_v19  ;;  %v4798_v63 = vpop.f32.mrf.mxu0 }
 0x1d3   : > { %v1279_v1 = vpop.f32.mrf.mxu1 }
 0x1d4   : > { %v2941_v2 = vmul.f32 -1.442695, %v1481_v61  ;;  %v1280_v3 = vadd.f32 %v1279_v1, %v893_v21  ;;  %v4801_v5 = vpop.f32.mrf.mxu0 }
 0x1d5   : > { %v1281_v6 = vpop.f32.mrf.mxu1 }
 0x1d6   : > { %3647 = vpow2.f32 %v2941_v2  ;;  %v1484_v7 = vadd.f32 %v4791_v55, %v1280_v3  ;;  %v1282_v8 = vadd.f32 %v1281_v6, %v895_v23  ;;  %v4804_v9 = vpop.f32.mrf.mxu0  ;;  %v4813_v23 = vrot.slane %v1461_v13, %v4770_v45 }
 0x1d7   : > { %v1285_v10 = vpop.f32.mrf.mxu1 }
 0x1d8   : > { %v2942_v11 = vmul.f32 -1.442695, %v1484_v7  ;;  %v1286_v12 = vadd.f32 %v1285_v10, %v899_v25  ;;  %v4807_v14 = vpop.f32.mrf.mxu0  ;;  %v1482_v1 = vadd.f32 %v4813_v23, %v1278_v62 }
 0x1d9   : > { %v1287_v15 = vpop.f32.mrf.mxu1 }
 0x1da   : > { %3649 = vpow2.f32 %v2942_v11  ;;  %v1487_v16 = vadd.f32 %v4791_v55, %v1286_v12  ;;  %v1288_v17 = vadd.f32 %v1287_v15, %v901_v27  ;;  %v4810_v0 = vpop.f32.mrf.mxu0 }
 0x1db   : > { %v1289_v19 = vpop.f32.mrf.mxu1 }
 0x1dc   : > { %v2943_v21 = vmul.f32 -1.442695, %v1487_v16  ;;  %v1290_v33 = vadd.f32 %v1289_v19, %v903_v29  ;;  %v4815_v41 = vpop.f32.mrf.mxu0 }
 0x1dd   : > { %v1291_v25 = vpop.f32.mrf.mxu1 }
 0x1de   : > { %3651 = vpow2.f32 %v2943_v21  ;;  %v1490_v50 = vadd.f32 %v4791_v55, %v1290_v33  ;;  %v1292_v57 = vadd.f32 %v1291_v25, %v905_v31  ;;  %v4818_v58 = vpop.f32.mrf.mxu0 }
 0x1df   : > { %v1295_v60 = vpop.f32.mrf.mxu1 }
 0x1e0   : > { %v2944_v61 = vmul.f32 -1.442695, %v1490_v50  ;;  %v1296_v27 = vadd.f32 %v1295_v60, %v909_v34  ;;  %v4821_v2 = vpop.f32.mrf.mxu0  ;;  %v1485_v34 = vadd.f32 %v4813_v23, %v1282_v8 }
 0x1e1   : > { %v1297_v29 = vpop.f32.mrf.mxu1 }
 0x1e2   : > { %3653 = vpow2.f32 %v2944_v61  ;;  %v1493_v3 = vadd.f32 %v4791_v55, %v1296_v27  ;;  %v1298_v4 = vadd.f32 %v1297_v29, %v4750_v36  ;;  %v4825_v7 = vpop.f32.mrf.mxu0 }
 0x1e3   : > { %v3648_v6 = vpop.eup %3647  ;;  %v1299_v10 = vpop.f32.mrf.mxu1  ;;  %3655 = vtanh.f32 %v1482_v1 }
 0x1e4   : > { %v1911_v31 = vadd.f32 1.0, %v3648_v6  ;;  %v2945_v11 = vmul.f32 -1.442695, %v1493_v3  ;;  %v1300_v12 = vadd.f32 %v1299_v10, %v4756_v39  ;;  %v4829_v62 = vpop.f32.mrf.mxu0  ;;  %v1488_v39 = vadd.f32 %v4813_v23, %v1288_v17 }
 0x1e5   : > { %v1301_v13 = vpop.f32.mrf.mxu1  ;;  %v1491_v17 = vadd.f32 %v4813_v23, %v1292_v57 }
 0x1e6   : > { %3657 = vrcp.f32 %v1911_v31  ;;  %v1496_v15 = vadd.f32 %v4791_v55, %v1300_v12  ;;  %v1302_v16 = vadd.f32 %v1301_v13, %v4763_v42  ;;  %v4833_v19 = vpop.f32.mrf.mxu0 }
 0x1e7   : > { %v3650_v36 = vpop.eup %3649  ;;  %3659 = vpow2.f32 %v2945_v11  ;;  %v1305_v21 = vpop.f32.mrf.mxu1  ;;  %v1464_v11 = vsub.s32 4, %v4754_v38  ;;  %v1494_v38 = vadd.f32 %v4813_v23, %v1298_v4 }
 0x1e8   : > { %v1912_v33 = vadd.f32 1.0, %v3650_v36  ;;  %v2946_v25 = vmul.f32 -1.442695, %v1496_v15  ;;  %3661 = vtanh.f32 %v1485_v34  ;;  %v1306_v8 = vadd.f32 %v1305_v21, %v4772_v46  ;;  %v4837_v50 = vpop.f32.mrf.mxu0 }
 0x1e9   : > { %v1307_v60 = vpop.f32.mrf.mxu1  ;;  %v1465_v21 = vrot.slane %v4767_v44, %v1464_v11 }
 0x1ea   : > { %3663 = vrcp.f32 %v1912_v33  ;;  %v1308_v61 = vadd.f32 %v1307_v60, %v4776_v48  ;;  %v1499_v42 = vadd.f32 %v4791_v55, %v1306_v8  ;;  %v4841_v1 = vpop.f32.mrf.mxu0 }
 0x1eb   : > { %v3652_v27 = vpop.eup %3651  ;;  %3665 = vpow2.f32 %v2946_v25  ;;  %v1309_v29 = vpop.f32.mrf.mxu1  ;;  %v4858_v44 = vrot.slane %v1465_v21, %v4770_v45 }
 0x1ec   : > { %v1913_v3 = vadd.f32 1.0, %v3652_v27  ;;  %v1310_v6 = vadd.f32 %v1309_v29, %v4782_v51  ;;  %3667 = vtanh.f32 %v1488_v39  ;;  %v2947_v46 = vmul.f32 -1.442695, %v1499_v42  ;;  %v4845_v10 = vpop.f32.mrf.mxu0 }
 0x1ed   : > { %v1311_v31 = vpop.f32.mrf.mxu1 }
 0x1ee   : > { %3669 = vrcp.f32 %v1913_v3  ;;  %v1502_v48 = vadd.f32 %v4791_v55, %v1310_v6  ;;  %v1312_v12 = vadd.f32 %v1311_v31, %v4786_v53  ;;  %v3369_v15 = vpop.f32.mrf.mxu0 }
 0x1ef   : > { %v3654_v34 = vpop.eup %3653  ;;  %3671 = vpow2.f32 %v2947_v46  ;;  %v1315_v13 = vpop.f32.mrf.mxu1  ;;  %v1397_v11 = vadd.f32 %v3369_v15, %v4732_v18 }
 0x1f0   : > { %v1914_v36 = vadd.f32 1.0, %v3654_v34  ;;  %v2948_v51 = vmul.f32 -1.442695, %v1502_v48  ;;  %3673 = vtanh.f32 %v1491_v17  ;;  %v1316_v57 = vadd.f32 %v1315_v13, %v4793_v56  ;;  %v1388_v25 = vpop.f32.mrf.mxu0  ;;  %v3656_v39 = vpop.eup %3655 }
 0x1f1   : > { %v1317_v33 = vpop.f32.mrf.mxu1 }
 0x1f2   : > { %3675 = vrcp.f32 %v1914_v36  ;;  %v1318_v8 = vadd.f32 %v1317_v33, %v4795_v59  ;;  %v1505_v60 = vadd.f32 %v4791_v55, %v1316_v57  ;;  %v3370_v42 = vpop.f32.mrf.mxu0  ;;  %v1497_v59 = vadd.f32 %v4813_v23, %v1302_v16 }
 0x1f3   : > { %v3658_v53 = vpop.eup %3657  ;;  %3677 = vpow2.f32 %v2948_v51  ;;  %v1319_v27 = vpop.f32.mrf.mxu1  ;;  %v1500_v16 = vadd.f32 %v4813_v23, %v1308_v61  ;;  %v1400_v18 = vadd.f32 %v3370_v42, %v4736_v22 }
 0x1f4   : > { %v3660_v29 = vpop.eup %3659  ;;  %v4855_v3 = vmul.f32 %v3658_v53, %v3656_v39  ;;  %v2949_v6 = vmul.f32 -1.442695, %v1505_v60  ;;  %v1320_v17 = vadd.f32 %v1319_v27, %v4798_v63  ;;  %v1391_v4 = vpop.f32.mrf.mxu0  ;;  %3679 = vtanh.f32 %v1494_v38 }
 0x1f5   : > { %v1915_v56 = vadd.f32 1.0, %v3660_v29  ;;  %v1321_v46 = vpop.f32.mrf.mxu1  ;;  %v3662_v31 = vpop.eup %3661  ;;  %v1389_v63 = vadd.f32 %v1388_v25, %v4734_v20  ;;  %v1503_v53 = vadd.f32 %v4813_v23, %v1312_v12  ;;  %v1489_v60 = vadd.f32 %v4858_v44, %v1397_v11 }
 0x1f6   : > { %v4864_v48 = vadd.f32 %v1321_v46, %v4801_v5  ;;  %v1508_v13 = vadd.f32 %v4791_v55, %v1320_v17  ;;  %v3373_v51 = vpop.f32.mrf.mxu0  ;;  %v1506_v20 = vadd.f32 %v4813_v23, %v1318_v8  ;;  %v1392_v25 = vadd.f32 %v1391_v4, %v4738_v24 }
 0x1f7   : > { %v3664_v34 = vpop.eup %3663  ;;  %3681 = vrcp.f32 %v1915_v56  ;;  %v1325_v36 = vpop.f32.mrf.mxu1  ;;  %v1483_v12 = vadd.f32 %v4858_v44, %v1389_v63  ;;  %v1492_v46 = vadd.f32 %v4858_v44, %v1400_v18 }
 0x1f8   : > { %v3666_v57 = vpop.eup %3665  ;;  %v4867_v21 = vmul.f32 %v3664_v34, %v3662_v31  ;;  %3683 = vpow2.f32 %v2949_v6  ;;  %v2950_v39 = vmul.f32 -1.442695, %v1508_v13  ;;  %v1404_v15 = vpop.f32.mrf.mxu0  ;;  %v1326_v27 = vadd.f32 %v1325_v36, %v4804_v9 }
 0x1f9   : > { %v1916_v33 = vadd.f32 1.0, %v3666_v57  ;;  %v1327_v5 = vpop.f32.mrf.mxu1  ;;  %v3668_v38 = vpop.eup %3667  ;;  %3685 = vtanh.f32 %v1497_v59  ;;  %v1486_v34 = vadd.f32 %v4858_v44, %v1392_v25  ;;  %v1413_v13 = vadd.f32 %v3373_v51, %v4740_v26 }
 0x1fa   : > { %v4878_v61 = vadd.f32 %v1327_v5, %v4807_v14  ;;  %v3374_v42 = vpop.f32.mrf.mxu0  ;;  %v1511_v17 = vadd.f32 %v4791_v55, %v1326_v27  ;;  %v2959_v14 = vmul.f32 -1.442695, %v1489_v60  ;;  %v2960_v5 = vmul.f32 -1.442695, %v1492_v46 }
 0x1fb   : > { %v3670_v29 = vpop.eup %3669  ;;  %3687 = vrcp.f32 %v1916_v33  ;;  %v1329_v22 = vpop.f32.mrf.mxu1 }
 0x1fc   : > { %v3672_v56 = vpop.eup %3671  ;;  %v4880_v6 = vmul.f32 %v3670_v29, %v3668_v38  ;;  %3689 = vpow2.f32 %v2950_v39  ;;  %v1407_v31 = vpop.f32.mrf.mxu0  ;;  %v2951_v4 = vmul.f32 -1.442695, %v1511_v17  ;;  %v1330_v59 = vadd.f32 %v1329_v22, %v4810_v0 }
 0x1fd   : > { %v1917_v9 = vadd.f32 1.0, %v3672_v56  ;;  %3691 = vtanh.f32 %v1500_v16  ;;  %v1331_v8 = vpop.f32.mrf.mxu1  ;;  %v3674_v24 = vpop.eup %3673  ;;  %v2957_v39 = vmul.f32 -1.442695, %v1483_v12  ;;  %v1405_v38 = vadd.f32 %v1404_v15, %v4742_v28 }
 0x1fe   : > { %3693 = vtanh.f32 %v1503_v53  ;;  %v4889_v36 = vadd.f32 %v1331_v8, %v4815_v41  ;;  %v4891_v63 = vpop.f32.mrf.mxu0  ;;  %v1514_v18 = vadd.f32 %v4791_v55, %v1330_v59  ;;  %v1416_v41 = vadd.f32 %v3374_v42, %v4744_v30 }
 0x1ff   : > { %v3676_v11 = vpop.eup %3675  ;;  %3695 = vrcp.f32 %v1917_v9  ;;  %v1335_v57 = vpop.f32.mrf.mxu1  ;;  %v2958_v29 = vmul.f32 -1.442695, %v1486_v34  ;;  %v1495_v30 = vadd.f32 %v4858_v44, %v1405_v38  ;;  %v1509_v12 = vadd.f32 %v4813_v23, %v4864_v48 }
 0x200   : > { %v3678_v33 = vpop.eup %3677  ;;  %v4893_v16 = vmul.f32 %v3676_v11, %v3674_v24  ;;  %3697 = vtanh.f32 %v1506_v20  ;;  %v2952_v26 = vmul.f32 -1.442695, %v1514_v18  ;;  %v1336_v51 = vadd.f32 %v1335_v57, %v4818_v58  ;;  %v4899_v60 = vpop.f32.mrf.mxu0 }
 0x201   : > { %v1918_v0 = vadd.f32 1.0, %v3678_v33  ;;  %3699 = vpow2.f32 %v2951_v4  ;;  %v1337_v53 = vpop.f32.mrf.mxu1  ;;  %v3680_v27 = vpop.eup %3679  ;;  %v1501_v20 = vadd.f32 %v4858_v44, %v1413_v13  ;;  %v1504_v17 = vadd.f32 %v4858_v44, %v1416_v41 }
 0x202   : > { %3701 = vpow2.f32 %v2959_v14  ;;  %v4903_v25 = vadd.f32 %v1337_v53, %v4821_v2  ;;  %v4911_v9 = vpop.f32.mrf.mxu0  ;;  %v1517_v8 = vadd.f32 %v4791_v55, %v1336_v51  ;;  %v2961_v34 = vmul.f32 -1.442695, %v1495_v30 }
 0x203   : > { %3703 = vrcp.f32 %v1918_v0  ;;  %v1339_v22 = vpop.f32.mrf.mxu1  ;;  %v2963_v46 = vmul.f32 -1.442695, %v1501_v20  ;;  %v1408_v48 = vadd.f32 %v1407_v31, %v4746_v32  ;;  %v2964_v18 = vmul.f32 -1.442695, %v1504_v17 }
 0x204   : > { %v3682_v56 = vpop.eup %3681  ;;  %3705 = vpow2.f32 %v2957_v39  ;;  %v1340_v24 = vadd.f32 %v1339_v22, %v4825_v7  ;;  %v4921_v0 = vpop.f32.mrf.mxu0 }
 0x205   : > { %v3684_v28 = vpop.eup %3683  ;;  %v4905_v15 = vmul.f32 %v3682_v56, %v3680_v27  ;;  %3707 = vpow2.f32 %v2960_v5  ;;  %v1341_v58 = vpop.f32.mrf.mxu1  ;;  %v2953_v5 = vmul.f32 -1.442695, %v1517_v8  ;;  %v1498_v41 = vadd.f32 %v4858_v44, %v1408_v48 }
 0x206   : > { %v1919_v42 = vadd.f32 1.0, %v3684_v28  ;;  %3709 = vpow2.f32 %v2952_v26  ;;  %v3686_v2 = vpop.eup %3685  ;;  %v4919_v13 = vadd.f32 %v1341_v58, %v4829_v62  ;;  %v1512_v26 = vadd.f32 %v4813_v23, %v4878_v61 }
 0x207   : > { %3711 = vpow2.f32 %v2958_v29  ;;  %v1345_v14 = vpop.f32.mrf.mxu1  ;;  %v4932_v29 = vpop.f32.mrf.mxu0  ;;  %v2962_v58 = vmul.f32 -1.442695, %v1498_v41  ;;  %v1518_v41 = vadd.f32 %v4813_v23, %v4903_v25 }
 0x208   : > { %v3688_v4 = vpop.eup %3687  ;;  %3713 = vrcp.f32 %v1919_v42  ;;  %v1346_v32 = vadd.f32 %v1345_v14, %v4833_v19  ;;  %v1515_v19 = vadd.f32 %v4813_v23, %v4889_v36  ;;  %v1429_v36 = vadd.f32 %v4891_v63, %v4748_v35  ;;  %v1545_v35 = vld [vmem:[%s5320_s7] sm:$0x1] }
 0x209   : > { %v3690_v59 = vpop.eup %3689  ;;  %v4915_v11 = vmul.f32 %v3688_v4, %v3686_v2  ;;  %v1347_v57 = vpop.f32.mrf.mxu1  ;;  %3715 = vtanh.f32 %v1509_v12 }
 0x20a   : > { %v3692_v33 = vpop.eup %3691  ;;  %v1920_v39 = vadd.f32 1.0, %v3690_v59  ;;  %3717 = vpow2.f32 %v2963_v46  ;;  %v4930_v51 = vadd.f32 %v1347_v57, %v4837_v50  ;;  %v1520_v50 = vadd.f32 %v4791_v55, %v1340_v24  ;;  %v4939_v12 = vpop.f32.mrf.mxu0 }
 0x20b   : > { %v3694_v7 = vpop.eup %3693  ;;  %v1349_v38 = vpop.f32.mrf.mxu1 }
 0x20c   : > { %v3696_v53 = vpop.eup %3695  ;;  %3719 = vrcp.f32 %v1920_v39  ;;  %v2954_v59 = vmul.f32 -1.442695, %v1520_v50  ;;  %v4949_v57 = vpop.f32.mrf.mxu0 }
 0x20d   : > { %v3698_v62 = vpop.eup %3697  ;;  %v4926_v31 = vmul.f32 %v3696_v53, %v3692_v33  ;;  %3721 = vpow2.f32 %v2961_v34  ;;  %v1351_v56 = vpop.f32.mrf.mxu1  ;;  %v1523_v34 = vadd.f32 %v4791_v55, %v1346_v32  ;;  %v1421_v53 = vadd.f32 %v4899_v60, %v4752_v37  ;;  %v1712_v37 = vld [vmem:[%s5322_s9] sm:$0x1] }
 0x20e   : > { %v3700_v27 = vpop.eup %3699  ;;  %3723 = vpow2.f32 %v2964_v18  ;;  %v4942_v17 = vadd.f32 %v1351_v56, %v4845_v10  ;;  %v1424_v56 = vadd.f32 %v4921_v0, %v4765_v43 }
 0x20f   : > { %v3702_v20 = vpop.eup %3701  ;;  %v1921_v22 = vadd.f32 1.0, %v3700_v27  ;;  %3725 = vpow2.f32 %v2953_v5  ;;  %v1513_v5 = vadd.f32 %v4858_v44, %v1429_v36 }
 0x210   : > { %v3704_v61 = vpop.eup %3703  ;;  %3727 = vtanh.f32 %v1512_v26  ;;  %v2025_v8 = vadd.f32 1.0, %v3702_v20  ;;  %v2955_v26 = vmul.f32 -1.442695, %v1523_v34  ;;  %v1546_v20 = vunpack.c.l.bf16 %v1545_v35 }
 0x211   : > { %v3706_v28 = vpop.eup %3705  ;;  %v4936_v30 = vmul.f32 %v3704_v61, %v3694_v7  ;;  %3729 = vrcp.f32 %v1921_v22  ;;  %v1350_v7 = vadd.f32 %v1349_v38, %v4841_v1  ;;  %v1432_v1 = vadd.f32 %v4911_v9, %v4758_v40  ;;  %v4964_v38 = vpop.f32.mrf.mxu0 }
 0x212   : > { %v3708_v42 = vpop.eup %3707  ;;  %3731 = vtanh.f32 %v1515_v19  ;;  %v2023_v48 = vadd.f32 1.0, %v3706_v28  ;;  %v2967_v40 = vmul.f32 -1.442695, %v1513_v5  ;;  %v1507_v9 = vadd.f32 %v4858_v44, %v1421_v53 }
 0x213   : > { %v3710_v2 = vpop.eup %3709  ;;  %3733 = vpow2.f32 %v2962_v58  ;;  %v2026_v33 = vadd.f32 1.0, %v3708_v42  ;;  %v1526_v25 = vadd.f32 %v4791_v55, %v1350_v7  ;;  %v1516_v50 = vadd.f32 %v4858_v44, %v1432_v1  ;;  %v3401_v42 = vpop.f32.mrf.mxu0 }
 0x214   : > { %v3712_v46 = vpop.eup %3711  ;;  %v1922_v14 = vadd.f32 1.0, %v3710_v2  ;;  %v1713_v2 = vunpack.c.l.bf16 %v1712_v37  ;;  %v4977_v43 = vrot.slane %v1546_v20, %v4770_v45  ;;  %v1510_v55 = vadd.f32 %v4858_v44, %v1424_v56 }
 0x215   : > { %v3714_v4 = vpop.eup %3713  ;;  %v2024_v18 = vadd.f32 1.0, %v3712_v46  ;;  %v2956_v0 = vmul.f32 -1.442695, %v1526_v25  ;;  %v2965_v36 = vmul.f32 -1.442695, %v1507_v9  ;;  %v1437_v56 = vadd.f32 %v4939_v12, %v4778_v49 }
 0x216   : > { %v4947_v24 = vmul.f32 %v3714_v4, %v3698_v62  ;;  %3735 = vrcp.f32 %v1922_v14  ;;  %v3716_v10 = vpop.eup %3715  ;;  %v3433_v14 = vpop.f32.mrf.mxu1  ;;  %v2968_v34 = vmul.f32 -1.442695, %v1516_v50  ;;  %v2966_v35 = vmul.f32 -1.442695, %v1510_v55 }
 0x217   : > { %v3718_v39 = vpop.eup %3717  ;;  %3737 = vrcp.f32 %v2025_v8  ;;  %v1519_v49 = vadd.f32 %v4858_v44, %v1437_v56 }
 0x218   : > { %3739 = vpow2.f32 %v2954_v59  ;;  %v2029_v22 = vadd.f32 1.0, %v3718_v39  ;;  %v1521_v39 = vadd.f32 %v4813_v23, %v4919_v13  ;;  %v1800_v5 = vpop.f32.mrf.mxu1 }
 0x219   : > { %v3720_v63 = vpop.eup %3719  ;;  %3741 = vrcp.f32 %v2023_v48  ;;  %v4981_v48 = vrot.slane %v1713_v2, %v4770_v45 }
 0x21a   : > { %v3722_v32 = vpop.eup %3721  ;;  %v4958_v62 = vmul.f32 %v3720_v63, %v3716_v10  ;;  %3743 = vrcp.f32 %v2026_v33  ;;  %v1633_v10 = vpop.f32.mrf.mxu0  ;;  %v1445_v63 = vadd.f32 %v4932_v29, %v4774_v47  ;;  %v1524_v29 = vadd.f32 %v4813_v23, %v4930_v51 }
 0x21b   : > { %v3724_v27 = vpop.eup %3723  ;;  %3745 = vrcp.f32 %v2024_v18  ;;  %v2027_v58 = vadd.f32 1.0, %v3722_v32  ;;  %v1642_v18 = vadd.f32 %v3401_v42, %v4977_v43  ;;  %v1809_v32 = vadd.f32 %v3433_v14, %v4981_v48 }
 0x21c   : > { %v3726_v60 = vpop.eup %3725  ;;  %3747 = vpow2.f32 %v2955_v26  ;;  %v2030_v8 = vadd.f32 1.0, %v3724_v27  ;;  %v1634_v20 = vadd.f32 %v1633_v10, %v4977_v43  ;;  %v1525_v47 = vadd.f32 %v4858_v44, %v1445_v63 }
 0x21d   : > { %v3728_v61 = vpop.eup %3727  ;;  %v1923_v19 = vadd.f32 1.0, %v3726_v60  ;;  %3749 = vtanh.f32 %v1518_v41  ;;  %v3402_v41 = vpop.f32.mrf.mxu0  ;;  %v2975_v27 = vmul.f32 -1.442695, %v1642_v18  ;;  %v1801_v25 = vadd.f32 %v1800_v5, %v4981_v48 }
 0x21e   : > { %v3730_v28 = vpop.eup %3729  ;;  %v3434_v60 = vpop.f32.mrf.mxu1  ;;  %v1645_v50 = vadd.f32 %v3402_v41, %v4977_v43  ;;  %v2971_v42 = vmul.f32 -1.442695, %v1525_v47  ;;  %v1527_v14 = vadd.f32 %v4813_v23, %v4942_v17 }
 0x21f   : > { %v4974_v46 = vmul.f32 %v3730_v28, %v3728_v61  ;;  %3751 = vrcp.f32 %v1923_v19  ;;  %v3732_v4 = vpop.eup %3731  ;;  %v2991_v19 = vmul.f32 -1.442695, %v1809_v32  ;;  %v2989_v12 = vmul.f32 -1.442695, %v1801_v25 }
 0x220   : > { %3753 = vrcp.f32 %v2029_v22  ;;  %v3734_v59 = vpop.eup %3733  ;;  %v1803_v2 = vpop.f32.mrf.mxu1 }
 0x221   : > { %3755 = vpow2.f32 %v2967_v40  ;;  %v2028_v26 = vadd.f32 1.0, %v3734_v59  ;;  %v1636_v40 = vpop.f32.mrf.mxu0  ;;  %v1804_v63 = vadd.f32 %v1803_v2, %v4981_v48 }
 0x222   : > { %3757 = vrcp.f32 %v2027_v58  ;;  %v2973_v58 = vmul.f32 -1.442695, %v1634_v20 }
 0x223   : > { %v3736_v33 = vpop.eup %3735  ;;  %3759 = vrcp.f32 %v2030_v8 }
 0x224   : > { %v4986_v7 = vmul.f32 %v3736_v33, %v3732_v4  ;;  %3761 = vpow2.f32 %v2956_v0  ;;  %v4990_v53 = vpop.eup %3737  ;;  %v1812_v4 = vadd.f32 %v3434_v60, %v4981_v48  ;;  %v1637_v33 = vadd.f32 %v1636_v40, %v4977_v43 }
 0x225   : > { %3763 = vpow2.f32 %v2965_v36  ;;  %v3740_v45 = vpop.eup %3739  ;;  %v3405_v36 = vpop.f32.mrf.mxu0  ;;  %v2990_v60 = vmul.f32 -1.442695, %v1804_v63 }
 0x226   : > { %3765 = vpow2.f32 %v2968_v34  ;;  %v4993_v13 = vpop.eup %3741  ;;  %v1924_v1 = vadd.f32 1.0, %v3740_v45  ;;  %v2976_v34 = vmul.f32 -1.442695, %v1645_v50  ;;  %v2992_v5 = vmul.f32 -1.442695, %v1812_v4 }
 0x227   : > { %3767 = vtanh.f32 %v1521_v39  ;;  %v4996_v37 = vpop.eup %3743  ;;  %v3437_v39 = vpop.f32.mrf.mxu1  ;;  %v1658_v45 = vadd.f32 %v3405_v36, %v4977_v43 }
 0x228   : > { %3769 = vpow2.f32 %v2966_v35  ;;  %v5001_v22 = vpop.eup %3745  ;;  %v2969_v35 = vmul.f32 -1.442695, %v1519_v49  ;;  %v1825_v20 = vadd.f32 %v3437_v39, %v4981_v48 }
 0x229   : > { %3771 = vrcp.f32 %v1924_v1  ;;  %v3748_v61 = vpop.eup %3747  ;;  %v1816_v47 = vpop.f32.mrf.mxu1 }
 0x22a   : > { %3773 = vrcp.f32 %v2028_v26  ;;  %v3750_v9 = vpop.eup %3749  ;;  %v1925_v28 = vadd.f32 1.0, %v3748_v61  ;;  %v1649_v26 = vpop.f32.mrf.mxu0  ;;  %v2979_v61 = vmul.f32 -1.442695, %v1658_v45  ;;  %v1817_v50 = vadd.f32 %v1816_v47, %v4981_v48 }
 0x22b   : > { %3775 = vpow2.f32 %v2975_v27  ;;  %v2974_v27 = vmul.f32 -1.442695, %v1637_v33  ;;  %v1650_v56 = vadd.f32 %v1649_v26, %v4977_v43 }
 0x22c   : > { %v3752_v51 = vpop.eup %3751  ;;  %3777 = vtanh.f32 %v1524_v29  ;;  %v2993_v39 = vmul.f32 -1.442695, %v1817_v50 }
 0x22d   : > { %v5007_v8 = vpop.eup %3753  ;;  %v5009_v55 = vmul.f32 %v3752_v51, %v3750_v9  ;;  %3779 = vrcp.f32 %v1925_v28  ;;  %v3438_v51 = vpop.f32.mrf.mxu1  ;;  %v2977_v49 = vmul.f32 -1.442695, %v1650_v56 }
 0x22e   : > { %v3756_v0 = vpop.eup %3755  ;;  %3781 = vpow2.f32 %v2991_v19  ;;  %v3406_v19 = vpop.f32.mrf.mxu0 }
 0x22f   : > { %5380 = vst [vmem:[#allocation28_spill] sm:$0xff] %v5009_v55  ;;  %v5015_v59 = vpop.eup %3757  ;;  %3783 = vpow2.f32 %v2973_v58  ;;  %v2033_v41 = vadd.f32 1.0, %v3756_v0  ;;  %v2995_v58 = vmul.f32 -1.442695, %v1825_v20  ;;  %v1661_v0 = vadd.f32 %v3406_v19, %v4977_v43 }
 0x230   : > { %v5017_v10 = vpop.eup %3759  ;;  %3785 = vpow2.f32 %v2971_v42 }
 0x231   : > { %v3762_v18 = vpop.eup %3761  ;;  %3787 = vpow2.f32 %v2989_v12  ;;  %v2980_v26 = vmul.f32 -1.442695, %v1661_v0 }
 0x232   : > { %v5021_v23 = vpop.eup %3763  ;;  %v1926_v17 = vadd.f32 1.0, %v3762_v18  ;;  %3789 = vtanh.f32 %v1527_v14  ;;  %v1652_v14 = vpop.f32.mrf.mxu0  ;;  %v1828_v18 = vadd.f32 %v3438_v51, %v4981_v48 }
 0x233   : > { %v5024_v32 = vpop.eup %3765  ;;  %3791 = vpow2.f32 %v2976_v34 }
 0x234   : > { %v3768_v1 = vpop.eup %3767  ;;  %3793 = vrcp.f32 %v1926_v17  ;;  %v2996_v47 = vmul.f32 -1.442695, %v1828_v18 }
 0x235   : > { %v5027_v29 = vpop.eup %3769  ;;  %3795 = vpow2.f32 %v2969_v35  ;;  %v1819_v35 = vpop.f32.mrf.mxu1 }
 0x236   : > { %v3772_v25 = vpop.eup %3771  ;;  %3797 = vpow2.f32 %v2992_v5  ;;  %v1653_v5 = vadd.f32 %v1652_v14, %v4977_v43 }
 0x237   : > { %v5030_v40 = vpop.eup %3773  ;;  %3799 = vrcp.f32 %v2033_v41  ;;  %v5032_v9 = vmul.f32 %v3772_v25, %v3768_v1 }
 0x238   : > { %v3776_v28 = vpop.eup %3775  ;;  %3801 = vpow2.f32 %v2974_v27  ;;  %v1820_v27 = vadd.f32 %v1819_v35, %v4981_v48 }
 0x239   : > { %5381 = vst [vmem:[#allocation29_spill] sm:$0xff] %v5032_v9  ;;  %v3778_v42 = vpop.eup %3777  ;;  %v2121_v2 = vadd.f32 1.0, %v3776_v28  ;;  %3803 = vpow2.f32 %v2990_v60  ;;  %v3409_v60 = vpop.f32.mrf.mxu0 }
 0x23a   : > { %v3780_v12 = vpop.eup %3779  ;;  %3805 = vpow2.f32 %v2979_v61  ;;  %v2978_v61 = vmul.f32 -1.442695, %v1653_v5  ;;  %v2994_v51 = vmul.f32 -1.442695, %v1820_v27  ;;  %v5062_v5 = vld [vmem:[%s4631_s23] sm:$0xff]  }
 0x23b   : > { %v3782_v4 = vpop.eup %3781  ;;  %v5036_v36 = vmul.f32 %v3780_v12, %v3778_v42  ;;  %3807 = vrcp.f32 %v2121_v2  ;;  %v1674_v42 = vadd.f32 %v3409_v60, %v4977_v43  ;;  %v1665_v12 = vpop.f32.mrf.mxu0 }
 0x23c   : > { %v3784_v34 = vpop.eup %3783  ;;  %v2217_v33 = vadd.f32 1.0, %v3782_v4  ;;  %3809 = vpow2.f32 %v2995_v58  ;;  %v5048_v58 = vld [vmem:[%s4628_s22 + $0x8] sm:$0xff]  }
 0x23d   : > { %5382 = vst [vmem:[#allocation30_spill] sm:$0xff] %v5036_v36  ;;  %v5039_v63 = vpop.eup %3785  ;;  %v2119_v17 = vadd.f32 1.0, %v3784_v34  ;;  %3811 = vpow2.f32 %v2977_v49  ;;  %v3089_v14 = vunpack.c.l.bf16 %v5048_v58  ;;  %v5055_v4 = vld [vmem:[%s4631_s23 + $0x8] sm:$0xff]   ;;  %v3441_v34 = vpop.f32.mrf.mxu1 }
 0x23e   : > { %v3788_v45 = vpop.eup %3787  ;;  %3813 = vrcp.f32 %v2217_v33  ;;  %v1841_v35 = vadd.f32 %v3441_v34, %v4981_v48  ;;  %v3121_v27 = vunpack.c.l.bf16 %v5055_v4 }
 0x23f   : > { %v3790_v41 = vpop.eup %3789  ;;  %3815 = vrcp.f32 %v2119_v17  ;;  %v2215_v1 = vadd.f32 1.0, %v3788_v45  ;;  %v1832_v34 = vpop.f32.mrf.mxu1 }
 0x240   : > { %v3792_v20 = vpop.eup %3791  ;;  %3817 = vpow2.f32 %v2993_v39  ;;  %v5058_v39 = vld [vmem:[%s4628_s22] sm:$0xff]  }
 0x241   : > { %v3794_v56 = vpop.eup %3793  ;;  %3819 = vrcp.f32 %v2215_v1  ;;  %v2122_v25 = vadd.f32 1.0, %v3792_v20 }
 0x242   : > { %v5043_v19 = vpop.eup %3795  ;;  %v5045_v28 = vmul.f32 %v3794_v56, %v3790_v41  ;;  %3821 = vpow2.f32 %v2980_v26  ;;  %v2983_v26 = vmul.f32 -1.442695, %v1674_v42  ;;  %v1666_v41 = vadd.f32 %v1665_v12, %v4977_v43 }
 0x243   : > { %5383 = vst [vmem:[#allocation31_spill] sm:$0xff] %v5043_v19  ;;  %v3798_v50 = vpop.eup %3797  ;;  %3823 = vrcp.f32 %v2122_v25  ;;  %v3085_v56 = vunpack.c.l.bf16 %v5058_v39 }
 0x244   : > { %5384 = vst [vmem:[#allocation32_spill] sm:$0xff] %v5045_v28  ;;  %v5051_v2 = vpop.eup %3799  ;;  %v2218_v49 = vadd.f32 1.0, %v3798_v50  ;;  %3825 = vpow2.f32 %v2996_v47 }
 0x245   : > { %v3802_v0 = vpop.eup %3801  ;;  %3827 = vpow2.f32 %v2978_v61  ;;  %v3117_v61 = vunpack.c.l.bf16 %v5062_v5 }
 0x246   : > { %v3804_v33 = vpop.eup %3803  ;;  %3829 = vrcp.f32 %v2218_v49  ;;  %v2120_v18 = vadd.f32 1.0, %v3802_v0  ;;  %v2981_v0 = vmul.f32 -1.442695, %v1666_v41  ;;  %v3410_v41 = vpop.f32.mrf.mxu0 }
 0x247   : > { %v3806_v17 = vpop.eup %3805  ;;  %v2216_v45 = vadd.f32 1.0, %v3804_v33  ;;  %3831 = vpow2.f32 %v2994_v51  ;;  %v2999_v51 = vmul.f32 -1.442695, %v1841_v35 }
 0x248   : > { %v3808_v1 = vpop.eup %3807  ;;  %3833 = vrcp.f32 %v2120_v18  ;;  %v2125_v20 = vadd.f32 1.0, %v3806_v17 }
 0x249   : > { %v3810_v47 = vpop.eup %3809  ;;  %v2313_v60 = vmul.f32 %v3808_v1, %v3089_v14  ;;  %3835 = vrcp.f32 %v2216_v45  ;;  %v3090_v45 = vunpack.c.h.bf16 %v5048_v58  ;;  %v3122_v1 = vunpack.c.h.bf16 %v5055_v4 }
 0x24a   : > { %v3812_v25 = vpop.eup %3811  ;;  %3837 = vrcp.f32 %v2125_v20  ;;  %v2221_v50 = vadd.f32 1.0, %v3810_v47  ;;  %v5072_v20 = vld [vmem:[%s4628_s22 + $0x18] sm:$0xff]   ;;  %v3086_v4 = vunpack.c.h.bf16 %v5058_v39  ;;  %v5091_v39 = vld [vmem:[%s4631_s23 + $0x10] sm:$0xff]  }
 0x24b   : > { %v3814_v42 = vpop.eup %3813  ;;  %v2329_v49 = vadd.f32 %v2313_v60, %v4880_v6  ;;  %v2123_v12 = vadd.f32 1.0, %v3812_v25  ;;  %3839 = vpow2.f32 %v2983_v26  ;;  %v1833_v26 = vadd.f32 %v1832_v34, %v4981_v48 }
 0x24c   : > { %v3816_v33 = vpop.eup %3815  ;;  %v2377_v18 = vmul.f32 %v3814_v42, %v3121_v27  ;;  %3841 = vrcp.f32 %v2221_v50  ;;  %v3118_v50 = vunpack.c.h.bf16 %v5062_v5  ;;  %v5083_v42 = vld [vmem:[%s4631_s23 + $0x18] sm:$0xff]  }
 0x24d   : > { %v3818_v14 = vpop.eup %3817  ;;  %v2311_v17 = vmul.f32 %v3816_v33, %v3085_v56  ;;  %3843 = vrcp.f32 %v2123_v12  ;;  %v3442_v56 = vpop.f32.mrf.mxu1  ;;  %v5088_v33 = vld [vmem:[%s4628_s22 + $0x10] sm:$0xff]   ;;  %v2997_v5 = vmul.f32 -1.442695, %v1833_v26 }
 0x24e   : > { %v3820_v35 = vpop.eup %3819  ;;  %v5074_v47 = vadd.f32 %v2377_v18, %v2329_v49  ;;  %v2219_v6 = vadd.f32 1.0, %v3818_v14  ;;  %3845 = vpow2.f32 %v2999_v51  ;;  %v3097_v51 = vunpack.c.l.bf16 %v5072_v20 }
 0x24f   : > { %v3822_v27 = vpop.eup %3821  ;;  %v2327_v60 = vadd.f32 %v2311_v17, %v4855_v3  ;;  %v2375_v58 = vmul.f32 %v3820_v35, %v3117_v61  ;;  %3847 = vpow2.f32 %v2981_v0  ;;  %v1677_v61 = vadd.f32 %v3410_v41, %v4977_v43  ;;  %v1668_v17 = vpop.f32.mrf.mxu0 }
 0x250   : > { %v3824_v25 = vpop.eup %3823  ;;  %3849 = vtanh.f32 %v5074_v47  ;;  %v2126_v49 = vadd.f32 1.0, %v3822_v27  ;;  %v1844_v14 = vadd.f32 %v3442_v56, %v4981_v48  ;;  %v3125_v41 = vunpack.c.l.bf16 %v5091_v39 }
 0x251   : > { %v3826_v12 = vpop.eup %3825  ;;  %v5085_v34 = vadd.f32 %v2375_v58, %v2327_v60  ;;  %v2314_v3 = vmul.f32 %v3824_v25, %v3090_v45  ;;  %3851 = vrcp.f32 %v2219_v6  ;;  %v3129_v45 = vunpack.c.l.bf16 %v5083_v42 }
 0x252   : > { %v3828_v0 = vpop.eup %3827  ;;  %3853 = vrcp.f32 %v2126_v49  ;;  %v2222_v18 = vadd.f32 1.0, %v3826_v12  ;;  %v3093_v25 = vunpack.c.l.bf16 %v5088_v33  ;;  %v1835_v49 = vpop.f32.mrf.mxu1  ;;  %v2984_v12 = vmul.f32 -1.442695, %v1677_v61 }
 0x253   : > { %v3830_v35 = vpop.eup %3829  ;;  %3855 = vtanh.f32 %v5085_v34  ;;  %v2330_v27 = vadd.f32 %v2314_v3, %v4893_v16  ;;  %v2124_v60 = vadd.f32 1.0, %v3828_v0  ;;  %v1669_v9 = vadd.f32 %v1668_v17, %v4977_v43  ;;  %v3413_v0 = vpop.f32.mrf.mxu0 }
 0x254   : > { %v3832_v6 = vpop.eup %3831  ;;  %v2378_v58 = vmul.f32 %v3830_v35, %v3122_v1  ;;  %3857 = vrcp.f32 %v2222_v18  ;;  %v3000_v3 = vmul.f32 -1.442695, %v1844_v14  ;;  %v3098_v35 = vunpack.c.h.bf16 %v5072_v20 }
 0x255   : > { %v3834_v26 = vpop.eup %3833  ;;  %3859 = vrcp.f32 %v2124_v60  ;;  %v2220_v56 = vadd.f32 1.0, %v3832_v6  ;;  %v1836_v18 = vadd.f32 %v1835_v49, %v4981_v48  ;;  %v1690_v14 = vadd.f32 %v3413_v0, %v4977_v43 }
 0x256   : > { %v3836_v28 = vpop.eup %3835  ;;  %v2394_v55 = vadd.f32 %v2378_v58, %v2330_v27  ;;  %v2312_v16 = vmul.f32 %v3834_v26, %v3086_v4  ;;  %3861 = vpow2.f32 %v2997_v5  ;;  %v2982_v5 = vmul.f32 -1.442695, %v1669_v9 }
 0x257   : > { %v3838_v19 = vpop.eup %3837  ;;  %v2376_v1 = vmul.f32 %v3836_v28, %v3118_v50  ;;  %3863 = vrcp.f32 %v2220_v56  ;;  %v3445_v28 = vpop.f32.mrf.mxu1  ;;  %v2987_v0 = vmul.f32 -1.442695, %v1690_v14 }
 0x258   : > { %v3840_v36 = vpop.eup %3839  ;;  %3865 = vtanh.f32 %v2394_v55  ;;  %v3195_v61 = vpack.c.bf16 %v2394_v55, %v5074_v47  ;;  %v2328_v17 = vadd.f32 %v2312_v16, %v4867_v21  ;;  %v2317_v60 = vmul.f32 %v3838_v19, %v3097_v51  ;;  %v1681_v55 = vpop.f32.mrf.mxu0 }
 0x259   : > { %v3842_v27 = vpop.eup %3841  ;;  %v2129_v4 = vadd.f32 1.0, %v3840_v36  ;;  %3867 = vpow2.f32 %v2984_v12  ;;  %v2998_v36 = vmul.f32 -1.442695, %v1836_v18  ;;  %v1857_v9 = vadd.f32 %v3445_v28, %v4981_v48 }
 0x25a   : > { %v3844_v50 = vpop.eup %3843  ;;  %3248 = vst [vmem:[%s5107_s30 + $0x8] sm:$0xff] %v3195_v61   ;;  %v2392_v20 = vadd.f32 %v2376_v1, %v2328_v17  ;;  %v2333_v6 = vadd.f32 %v2317_v60, %v4926_v31  ;;  %v2381_v58 = vmul.f32 %v3842_v27, %v3129_v45  ;;  %3869 = vpow2.f32 %v3000_v3  ;;  %v3414_v17 = vpop.f32.mrf.mxu0 }
 0x25b   : > { %v3846_v21 = vpop.eup %3845  ;;  %v2315_v19 = vmul.f32 %v3844_v50, %v3093_v25  ;;  %3871 = vrcp.f32 %v2129_v4  ;;  %v1682_v12 = vadd.f32 %v1681_v55, %v4977_v43  ;;  %v1848_v25 = vpop.f32.mrf.mxu1  ;;  %v3126_v61 = vunpack.c.h.bf16 %v5091_v39  ;;  %v5126_v4 = vld [vmem:[%s4628_s22 + $0x28] sm:$0xff]  }
 0x25c   : > { %v3848_v47 = vpop.eup %3847  ;;  %3873 = vtanh.f32 %v2392_v20  ;;  %v3190_v51 = vpack.c.bf16 %v2392_v20, %v5085_v34  ;;  %v5113_v49 = vadd.f32 %v2381_v58, %v2333_v6  ;;  %v2225_v26 = vadd.f32 1.0, %v3846_v21 }
 0x25d   : > { %v3850_v56 = vpop.eup %3849  ;;  %v2331_v31 = vadd.f32 %v2315_v19, %v4905_v15  ;;  %v2127_v45 = vadd.f32 1.0, %v3848_v47  ;;  %3875 = vpow2.f32 %v2982_v5  ;;  %v3130_v34 = vunpack.c.h.bf16 %v5083_v42 }
 0x25e   : > { %v3852_v16 = vpop.eup %3851  ;;  %v5118_v3 = vmul.f32 %v3850_v56, %v4990_v53  ;;  %3191 = vst [vmem:[%s5107_s30] sm:$0xff] %v3190_v51   ;;  %3877 = vtanh.f32 %v5113_v49  ;;  %v3094_v15 = vunpack.c.h.bf16 %v5088_v33  ;;  %v3003_v53 = vmul.f32 -1.442695, %v1857_v9  ;;  %v3446_v33 = vpop.f32.mrf.mxu1 }
 0x25f   : > { %v3854_v1 = vpop.eup %3853  ;;  %v2379_v18 = vmul.f32 %v3852_v16, %v3125_v41  ;;  %3879 = vrcp.f32 %v2225_v26  ;;  %v1849_v5 = vadd.f32 %v1848_v25, %v4981_v48  ;;  %v2985_v41 = vmul.f32 -1.442695, %v1682_v12  ;;  %v1684_v9 = vpop.f32.mrf.mxu0  ;;  %v5140_v25 = vld [vmem:[%s4631_s23 + $0x28] sm:$0xff]  }
 0x260   : > { %v3856_v60 = vpop.eup %3855  ;;  %v2318_v27 = vmul.f32 %v3854_v1, %v3098_v35  ;;  %3881 = vrcp.f32 %v2127_v45  ;;  %v1693_v35 = vadd.f32 %v3414_v17, %v4977_v43  ;;  %v3105_v55 = vunpack.c.l.bf16 %v5126_v4  ;;  %v1851_v56 = vpop.f32.mrf.mxu1  ;;  %v5143_v1 = vld [vmem:[%s4628_s22 + $0x20] sm:$0xff]  }
 0x261   : > { %v3858_v28 = vpop.eup %3857  ;;  %v5130_v42 = vmul.f32 %v3856_v60, %v4993_v13  ;;  %v2395_v14 = vadd.f32 %v2379_v18, %v2331_v31  ;;  %3883 = vpow2.f32 %v2998_v36  ;;  %v3001_v36 = vmul.f32 -1.442695, %v1849_v5 }
 0x262   : > { %v3860_v50 = vpop.eup %3859  ;;  %v2334_v39 = vadd.f32 %v2318_v27, %v4936_v30  ;;  %v2382_v20 = vmul.f32 %v3858_v28, %v3130_v34  ;;  %3885 = vpow2.f32 %v2987_v0  ;;  %v1860_v26 = vadd.f32 %v3446_v33, %v4981_v48 }
 0x263   : > { %v3862_v6 = vpop.eup %3861  ;;  %3887 = vtanh.f32 %v2395_v14  ;;  %v2316_v58 = vmul.f32 %v3860_v50, %v3094_v15  ;;  %v2988_v16 = vmul.f32 -1.442695, %v1693_v35  ;;  %v1685_v18 = vadd.f32 %v1684_v9, %v4977_v43 }
 0x264   : > { %v3864_v21 = vpop.eup %3863  ;;  %v2398_v13 = vadd.f32 %v2382_v20, %v2334_v39  ;;  %v2223_v19 = vadd.f32 1.0, %v3862_v6  ;;  %3889 = vpow2.f32 %v3003_v53  ;;  %v3137_v53 = vunpack.c.l.bf16 %v5140_v25 }
 0x265   : > { %v3866_v47 = vpop.eup %3865  ;;  %v2332_v30 = vadd.f32 %v2316_v58, %v4915_v11  ;;  %v2380_v51 = vmul.f32 %v3864_v21, %v3126_v61  ;;  %3891 = vpow2.f32 %v2985_v41  ;;  %v3004_v28 = vmul.f32 -1.442695, %v1860_v26 }
 0x266   : > { %v3868_v31 = vpop.eup %3867  ;;  %v2426_v45 = vmul.f32 %v3866_v47, %v4996_v37  ;;  %3893 = vtanh.f32 %v2398_v13  ;;  %v3205_v12 = vpack.c.bf16 %v2398_v13, %v5113_v49  ;;  %v1852_v49 = vadd.f32 %v1851_v56, %v4981_v48 }
 0x267   : > { %v3870_v34 = vpop.eup %3869  ;;  %v2396_v0 = vadd.f32 %v2380_v51, %v2332_v30  ;;  %3895 = vrcp.f32 %v2223_v19  ;;  %v2130_v11 = vadd.f32 1.0, %v3868_v31  ;;  %v2986_v33 = vmul.f32 -1.442695, %v1685_v18 }
 0x268   : > { %v3872_v15 = vpop.eup %3871  ;;  %v3155_v61 = vpack.c.bf16 %v2426_v45, %v5118_v3  ;;  %3250 = vst [vmem:[%s5107_s30 + $0x18] sm:$0xff] %v3205_v12   ;;  %v2226_v37 = vadd.f32 1.0, %v3870_v34  ;;  %3897 = vpow2.f32 %v3001_v36  ;;  %v3101_v3 = vunpack.c.l.bf16 %v5143_v1 }
 0x269   : > { %v3874_v17 = vpop.eup %3873  ;;  %3899 = vtanh.f32 %v2396_v0  ;;  %v3200_v60 = vpack.c.bf16 %v2396_v0, %v2395_v14  ;;  %v2321_v27 = vmul.f32 %v3872_v15, %v3105_v55  ;;  %v3002_v20 = vmul.f32 -1.442695, %v1852_v49 }
 0x26a   : > { %v3876_v5 = vpop.eup %3875  ;;  %3241 = vst [vmem:[%s5151_s13 + $0x8] sm:$0xff] %v3155_v61   ;;  %v2424_v43 = vmul.f32 %v3874_v17, %v5001_v22  ;;  %3901 = vrcp.f32 %v2130_v11  ;;  %v1448_v22 = vadd.f32 %v4949_v57, %v4784_v52  ;;  %v1440_v55 = vadd.f32 %v4964_v38, %v4788_v54 }
 0x26b   : > { %v3878_v41 = vpop.eup %3877  ;;  %3249 = vst [vmem:[%s5107_s30 + $0x10] sm:$0xff] %v3200_v60   ;;  %v2337_v48 = vadd.f32 %v2321_v27, %v4974_v46  ;;  %3903 = vrcp.f32 %v2226_v37  ;;  %v2128_v14 = vadd.f32 1.0, %v3876_v5  ;;  %v5165_v46 = vld [vmem:[%s4631_s23 + $0x20] sm:$0xff]   ;;  %v2031_v56 = vadd.f32 1.0, %v5021_v23 }
 0x26c   : > { %v3880_v50 = vpop.eup %3879  ;;  %v3150_v39 = vpack.c.bf16 %v2424_v43, %v5130_v42  ;;  %3905 = vpow2.f32 %v2988_v16  ;;  %v1528_v57 = vadd.f32 %v4858_v44, %v1448_v22  ;;  %v3133_v54 = vunpack.c.l.bf16 %v5165_v46  ;;  %v5189_v43 = vld [vmem:[%s4628_s22 + $0x38] sm:$0xff]  }
 0x26d   : > { %v3882_v35 = vpop.eup %3881  ;;  %v2385_v6 = vmul.f32 %v3880_v50, %v3137_v53  ;;  %3907 = vrcp.f32 %v2128_v14  ;;  %v1522_v30 = vadd.f32 %v4858_v44, %v1440_v55  ;;  %v2429_v16 = vmul.f32 %v3878_v41, %v5007_v8 }
 0x26e   : > { %v3884_v58 = vpop.eup %3883  ;;  %3151 = vst [vmem:[%s5151_s13] sm:$0xff] %v3150_v39   ;;  %3909 = vpow2.f32 %v3004_v28  ;;  %v2319_v42 = vmul.f32 %v3882_v35, %v3101_v3  ;;  %v3106_v34 = vunpack.c.h.bf16 %v5126_v4  ;;  %v2972_v44 = vmul.f32 -1.442695, %v1528_v57 }
 0x26f   : > { %v3886_v21 = vpop.eup %3885  ;;  %v5167_v13 = vadd.f32 %v2385_v6, %v2337_v48  ;;  %v2224_v19 = vadd.f32 1.0, %v3884_v58  ;;  %3911 = vpow2.f32 %v2986_v33  ;;  %v2970_v15 = vmul.f32 -1.442695, %v1522_v30  ;;  %v5197_v33 = vld [vmem:[%s4628_s22 + $0x30] sm:$0xff]   ;;  %s4281_s22 = smov [#allocation15]  }
 0x270   : > { %v3888_v36 = vpop.eup %3887  ;;  %v2133_v9 = vadd.f32 1.0, %v3886_v21  ;;  %3913 = vpow2.f32 %v3002_v20  ;;  %v2335_v31 = vadd.f32 %v2319_v42, %v4947_v24  ;;  %v3138_v24 = vunpack.c.h.bf16 %v5140_v25  ;;  %s4161_s1 = sshll.u32 %s4281_s22, 4  ;;  %s4162_s1 = int_to_ptr.vmem [resolvable:$false] %s4161_s1 }
 0x271   : > { %v3890_v52 = vpop.eup %3889  ;;  %v2427_v47 = vmul.f32 %v3888_v36, %v5015_v59  ;;  %3915 = vtanh.f32 %v5167_v13  ;;  %v3102_v4 = vunpack.c.h.bf16 %v5143_v1  ;;  %v2034_v27 = vadd.f32 1.0, %v5024_v32  ;;  %v5192_v1 = vld [vmem:[%s4631_s23 + $0x38] sm:$0xff]   ;;  %v3239_v36 = vld [vmem:[%s4631_s23 + $0x30] sm:$0xff]   ;;  %s4163_s23 = scalar_lea.vmem %s4162_s1, 2048  ;;  %p4164_p1 = scmp.lt.s32.totalorder %s5230_s11, %s4162_s1 }
 0x272   : > { %v3892_v38 = vpop.eup %3891  ;;  %3917 = vrcp.f32 %v2224_v19  ;;  %v2229_v51 = vadd.f32 1.0, %v3890_v52  ;;  %v3134_v14 = vunpack.c.h.bf16 %v5165_v46  ;;  %v3113_v39 = vunpack.c.l.bf16 %v5189_v43  ;;  %p4165_p3 = scmp.lt.s32.totalorder %s4163_s23, %s4157_s26 }
 0x273   : > { %v3894_v26 = vpop.eup %3893  ;;  %3919 = vrcp.f32 %v2133_v9  ;;  %v2131_v45 = vadd.f32 1.0, %v3892_v38  ;;  %v3145_v20 = vunpack.c.l.bf16 %v5192_v1  ;;  %v2032_v21 = vadd.f32 1.0, %v5027_v29 }
 0x274   : > { %v3896_v12 = vpop.eup %3895  ;;  %v2430_v59 = vmul.f32 %v3894_v26, %v5017_v10  ;;  %3921 = vrcp.f32 %v2229_v51  ;;  %v3109_v19 = vunpack.c.l.bf16 %v5197_v33  ;;  %v3141_v29 = vunpack.c.l.bf16 %v3239_v36  ;;  %p4166_p7 = por %p4165_p3, %p4164_p1 }
 0x275   : > { %v3898_v0 = vpop.eup %3897  ;;  %v2383_v11 = vmul.f32 %v3896_v12, %v3133_v54  ;;  %3923 = vrcp.f32 %v2131_v45  ;;  %v5386_v45 = vld [vmem:[#allocation31_spill] sm:$0xff] }
 0x276   : > { %v3900_v18 = vpop.eup %3899  ;;  %v3165_v23 = vpack.c.bf16 %v2430_v59, %v2429_v16  ;;  %v2227_v61 = vadd.f32 1.0, %v3898_v0  ;;  %3925 = vrcp.f32 %v2031_v56  ;;  %v2035_v12 = vadd.f32 1.0, %v5386_v45  ;;  %v5387_v59 = vld [vmem:[#allocation28_spill] sm:$0xff]  ;;  %p4167_p9 = pnand %p4166_p7, %p4160_p5 }
 0x277   : > { %v3902_v37 = vpop.eup %3901  ;;  %v2428_v8 = vmul.f32 %v3900_v18, %v5030_v40  ;;  %v5181_v10 = vadd.f32 %v2383_v11, %v2335_v31 }
 0x278   : > { %v3904_v49 = vpop.eup %3903  ;;  %3243 = vst [vmem:[%s5151_s13 + $0x18] sm:$0xff] %v3165_v23   ;;  %v2322_v17 = vmul.f32 %v3902_v37, %v3106_v34  ;;  %3927 = vrcp.f32 %v2227_v61  ;;  %v3146_v61 = vunpack.c.h.bf16 %v5192_v1 }
 0x279   : > { %v3906_v60 = vpop.eup %3905  ;;  %v3160_v25 = vpack.c.bf16 %v2428_v8, %v2427_v47  ;;  %3929 = vtanh.f32 %v5181_v10  ;;  %v2386_v5 = vmul.f32 %v3904_v49, %v3138_v24 }
 0x27a   : > { %v3908_v53 = vpop.eup %3907  ;;  %3931 = vpow2.f32 %v2972_v44  ;;  %v2338_v40 = vadd.f32 %v2322_v17, %v4986_v7  ;;  %v2134_v3 = vadd.f32 1.0, %v3906_v60  ;;  %v3114_v44 = vunpack.c.h.bf16 %v5189_v43 }
 0x27b   : > { %v3910_v28 = vpop.eup %3909  ;;  %3933 = vpow2.f32 %v2970_v15  ;;  %3242 = vst [vmem:[%s5151_s13 + $0x10] sm:$0xff] %v3160_v25   ;;  %v2320_v41 = vmul.f32 %v3908_v53, %v3102_v4  ;;  %v3142_v53 = vunpack.c.h.bf16 %v3239_v36 }
 0x27c   : > { %v3912_v48 = vpop.eup %3911  ;;  %v2402_v32 = vadd.f32 %v2386_v5, %v2338_v40  ;;  %3935 = vrcp.f32 %v2134_v3  ;;  %v2230_v50 = vadd.f32 1.0, %v3910_v28 }
 0x27d   : > { %v3914_v7 = vpop.eup %3913  ;;  %3937 = vrcp.f32 %v2034_v27  ;;  %v2132_v35 = vadd.f32 1.0, %v3912_v48  ;;  %v2336_v58 = vadd.f32 %v2320_v41, %v4958_v62  ;;  %v2037_v62 = vadd.f32 1.0, %v5039_v63  ;;  %v5388_v27 = vld [vmem:[#allocation32_spill] sm:$0xff] }
 0x27e   : > { %v3916_v22 = vpop.eup %3915  ;;  %3939 = vtanh.f32 %v2402_v32  ;;  %v3215_v6 = vpack.c.bf16 %v2402_v32, %v5167_v13  ;;  %v2228_v55 = vadd.f32 1.0, %v3914_v7  ;;  %v5389_v32 = vld [vmem:[#allocation29_spill] sm:$0xff] }
 0x27f   : > { %v3918_v46 = vpop.eup %3917  ;;  %v2433_v42 = vmul.f32 %v3916_v22, %v5051_v2  ;;  %3941 = vrcp.f32 %v2230_v50  ;;  %v5385_v2 = vld [vmem:[#allocation30_spill] sm:$0xff] }
 0x280   : > { %v3920_v9 = vpop.eup %3919  ;;  %3252 = vst [vmem:[%s5107_s30 + $0x28] sm:$0xff] %v3215_v6   ;;  %v2384_v52 = vmul.f32 %v3918_v46, %v3134_v14  ;;  %3943 = vrcp.f32 %v2132_v35 }
 0x281   : > { %v3922_v57 = vpop.eup %3921  ;;  %v2325_v47 = vmul.f32 %v3920_v9, %v3113_v39  ;;  %3945 = vrcp.f32 %v2228_v55 }
 0x282   : > { %v3924_v13 = vpop.eup %3923  ;;  %v2400_v54 = vadd.f32 %v2384_v52, %v2336_v58  ;;  %v2389_v38 = vmul.f32 %v3922_v57, %v3145_v20  ;;  %3947 = vrcp.f32 %v2032_v21 }
 0x283   : > { %v2341_v30 = vadd.f32 %v2325_v47, %v5385_v2  ;;  %v2323_v51 = vmul.f32 %v3924_v13, %v3109_v19  ;;  %v3926_v26 = vpop.eup %3925 }
 0x284   : > { %3949 = vtanh.f32 %v2400_v54  ;;  %v3210_v56 = vpack.c.bf16 %v2400_v54, %v5181_v10  ;;  %v3110_v10 = vunpack.c.h.bf16 %v5197_v33 }
 0x285   : > { %v3928_v31 = vpop.eup %3927  ;;  %v2405_v16 = vadd.f32 %v2389_v38, %v2341_v30  ;;  %v2339_v34 = vadd.f32 %v2323_v51, %v5387_v59  ;;  %3951 = vrcp.f32 %v2037_v62 }
 0x286   : > { %v3930_v0 = vpop.eup %3929  ;;  %3251 = vst [vmem:[%s5107_s30 + $0x20] sm:$0xff] %v3210_v56   ;;  %v2387_v63 = vmul.f32 %v3928_v31, %v3141_v29 }
 0x287   : > { %v3932_v11 = vpop.eup %3931  ;;  %v2431_v18 = vmul.f32 %v3930_v0, %v3926_v26  ;;  %3953 = vtanh.f32 %v2405_v16 }
 0x288   : > { %v3934_v15 = vpop.eup %3933  ;;  %v2403_v23 = vadd.f32 %v2387_v63, %v2339_v34  ;;  %3955 = vrcp.f32 %v2035_v12  ;;  %v2038_v17 = vadd.f32 1.0, %v3932_v11 }
 0x289   : > { %v3936_v24 = vpop.eup %3935  ;;  %v2036_v28 = vadd.f32 1.0, %v3934_v15 }
 0x28a   : > { %v3938_v37 = vpop.eup %3937  ;;  %3957 = vtanh.f32 %v2403_v23  ;;  %v2326_v8 = vmul.f32 %v3936_v24, %v3114_v44 }
 0x28b   : > { %v3940_v4 = vpop.eup %3939  ;;  %3959 = vrcp.f32 %v2038_v17 }
 0x28c   : > { %v3942_v49 = vpop.eup %3941  ;;  %v2434_v60 = vmul.f32 %v3940_v4, %v3938_v37  ;;  %v2342_v25 = vadd.f32 %v2326_v8, %v5388_v27 }
 0x28d   : > { %v3944_v40 = vpop.eup %3943  ;;  %v2390_v5 = vmul.f32 %v3942_v49, %v3146_v61 }
 0x28e   : > { %v3946_v43 = vpop.eup %3945  ;;  %v3175_v3 = vpack.c.bf16 %v2434_v60, %v2433_v42  ;;  %v2324_v1 = vmul.f32 %v3944_v40, %v3110_v10 }
 0x28f   : > { %v2406_v41 = vadd.f32 %v2390_v5, %v2342_v25  ;;  %v3948_v48 = vpop.eup %3947  ;;  %v2388_v33 = vmul.f32 %v3946_v43, %v3142_v53 }
 0x290   : > { %3245 = vst [vmem:[%s5151_s13 + $0x28] sm:$0xff] %v3175_v3   ;;  %v2340_v14 = vadd.f32 %v2324_v1, %v5389_v32 }
 0x291   : > { %v3950_v50 = vpop.eup %3949  ;;  %3961 = vtanh.f32 %v2406_v41  ;;  %v3225_v7 = vpack.c.bf16 %v2406_v41, %v2405_v16 }
 0x292   : > { %v2432_v39 = vmul.f32 %v3950_v50, %v3948_v48  ;;  %v2404_v20 = vadd.f32 %v2388_v33, %v2340_v14  ;;  %v3952_v35 = vpop.eup %3951  ;;  %3963 = vrcp.f32 %v2036_v28 }
 0x293   : > { %3254 = vst [vmem:[%s5107_s30 + $0x38] sm:$0xff] %v3225_v7  }
 0x294   : > { %v3954_v22 = vpop.eup %3953  ;;  %v3170_v6 = vpack.c.bf16 %v2432_v39, %v2431_v18  ;;  %3965 = vtanh.f32 %v2404_v20  ;;  %v3220_v58 = vpack.c.bf16 %v2404_v20, %v2403_v23 }
 0x295   : > { %v2437_v55 = vmul.f32 %v3954_v22, %v3952_v35  ;;  %v3956_v46 = vpop.eup %3955 }
 0x296   : > { %3244 = vst [vmem:[%s5151_s13 + $0x20] sm:$0xff] %v3170_v6   ;;  %3253 = vst [vmem:[%s5107_s30 + $0x30] sm:$0xff] %v3220_v58  }
 0x297   : > { %v3958_v21 = vpop.eup %3957 }
 0x298   : > { %4170 = shalt.err (!%p4167_p9)
}
 0x299   : > { %s4171_s28 = scalar_lea.hbm %s5228_s12, 1024  ;;  %s4175_s25 = scalar_lea.hbm %s5391_s4, 4096 }
 0x29a   : > { %p4172_p10 = scmp.ne.s32.totalorder %s5228_s12, %s4171_s28  ;;  %p4176_p13 = scmp.lt.s32.totalorder %s5228_s12, %s5391_s4 }
 0x29b   : > { %p4177_p2 = scmp.lt.s32.totalorder %s4175_s25, %s4171_s28 }
 0x29c   : > { %p4173_p6 = pnand %p4172_p10, %p5392_p11 }
 0x29d   : > { %p4178_p0 = por %p4177_p2, %p4176_p13 }
 0x29e   : > { %p4174_p8 = pneg %p4173_p6 }
 0x2a0   : > { %p4179_p12 = pnand %p4178_p0, %p4174_p8 }
 0x2a2   : > { %4182 = shalt.err (!%p4179_p12)
}
 0x2a3   : > { %s4282_s30 = smov 64   ;;  %s4283_s14 = smov 4   ;;  %v2435_v42 = vmul.f32 %v3958_v21, %v3956_v46  ;;  %v3960_v19 = vpop.eup %3959 }
 0x2a4   : > { %3468 = dma.vmem_to_hbm [thread:$0]  (%p5392_p11), %s5230_s11, 1024, %s5228_s12, %s2605_s6, %s4282_s30, %s4282_s30, %s4283_s14   ;;  %v3962_v36 = vpop.eup %3961 }
 0x2a5   : > { %v2438_v9 = vmul.f32 %v3962_v36, %v3960_v19  ;;  %v3964_v52 = vpop.eup %3963  ;;  %s2618_s0 = sshll.u32 %s5151_s13, 4  ;;  %s5393_s22 = sld [smem:[#allocation38_spill]]  ;;  %s5269_s0 = int_to_ptr.vmem [resolvable:$true] %s2618_s0 }
 0x2a6   : > { %v3966_v57 = vpop.eup %3965  ;;  %s2600_s11 = scalar_lea.sflag [#allocation4], %s4606_s24  ;;  %s4183_s12 = scalar_lea.vmem %s5269_s0, 1024 }
 0x2a7   : > { %v3185_v47 = vpack.c.bf16 %v2438_v9, %v2437_v55  ;;  %v2436_v13 = vmul.f32 %v3966_v57, %v3964_v52  ;;  %p4184_p4 = scmp.ne.s32.totalorder %s5269_s0, %s4183_s12  ;;  %s4284_s6 = smov [#allocation14]  }
 0x2a8   : > { %s4187_s23 = sshll.u32 %s4284_s6, 4  ;;  %s4188_s23 = int_to_ptr.vmem [resolvable:$false] %s4187_s23 }
 0x2a9   : > { %3247 = vst [vmem:[%s5151_s13 + $0x38] sm:$0xff] %v3185_v47   ;;  %v3180_v62 = vpack.c.bf16 %v2436_v13, %v2435_v42  ;;  %p4185_p5 = pnand %p4184_p4, %p5392_p11  ;;  %s4189_s21 = scalar_lea.vmem %s4188_s23, 2048 }
 0x2aa   : > { %p4190_p3 = scmp.lt.s32.totalorder %s5269_s0, %s4188_s23  ;;  %p4191_p7 = scmp.lt.s32.totalorder %s4189_s21, %s4183_s12 }
 0x2ab   : > { %s5267_s1 = scalar_lea.hbm %s5393_s22, %s3081_s10  ;;  %3246 = vst [vmem:[%s5151_s13 + $0x30] sm:$0xff] %v3180_v62   ;;  %p4186_p1 = pneg %p4185_p5 }
 0x2ac   : > { %p4192_p9 = por %p4191_p7, %p4190_p3 }
 0x2ae   : > { %p4193_p10 = pnand %p4192_p9, %p4186_p1 }
 0x2b0   : > { %4196 = shalt.err (!%p4193_p10)
}
 0x2b1   : > { %s4197_s13 = scalar_lea.hbm %s5267_s1, 1024  ;;  %s4201_s28 = scalar_lea.hbm %s5393_s22, 4096 }
 0x2b2   : > { %p4198_p6 = scmp.ne.s32.totalorder %s5267_s1, %s4197_s13  ;;  %p4202_p2 = scmp.lt.s32.totalorder %s5267_s1, %s5393_s22 }
 0x2b3   : > { %p4203_p0 = scmp.lt.s32.totalorder %s4201_s28, %s4197_s13 }
 0x2b4   : > { %p4199_p8 = pnand %p4198_p6, %p5392_p11 }
 0x2b5   : > { %p4204_p12 = por %p4203_p0, %p4202_p2 }
 0x2b6   : > { %p4200_p13 = pneg %p4199_p8 }
 0x2b8   : > { %p4205_p4 = pnand %p4204_p12, %p4200_p13 }
 0x2ba   : > { %4208 = shalt.err (!%p4205_p4)
}
 0x2bb   : > { %3467 = dma.vmem_to_hbm [thread:$0]  (%p5392_p11), %s5269_s0, 1024, %s5267_s1, %s2600_s11, %s4282_s30, %s4282_s30, %s4283_s14  }
 0x2bc PF: > { %s5394_s25 = sld [smem:[#allocation24_spill]]  ;;  %p3508_p5 = scmp.ge.s32.totalorder %s4267_s20, 2 }
 0x2bd   : > { %s5395_s15 = sld [smem:[#allocation27_spill]] }
 0x2c2   : > { %s2649_s16 = sand.u32 1, %s5394_s25  }
 0x2c3   : > { %p5396_p1 = scmp.ne.s32.totalorder %s5395_s15, 0  ;;  %s2650_s17 = scalar_lea.sflag [#allocation4], %s2649_s16 }
 0x2c5   : > { %p3495_p3 = pnand %p3508_p5, %p5396_p1 }
 0x2c7   : > { %p3496_p7 = pneg %p3495_p3 }
 0x2c9   : > { %4246 = dma.done.wait (%p3496_p7), %s2650_s17, 1024  }
 0x2ca   : > { %4248 = vsyncadd (%p3496_p7), %s2650_s17, 4294966272  ;;  %s2659_s26 = scalar_lea.sflag [#allocation16], %s2649_s16 }
 0x2cb   : > { %4250 = dma.done.wait (%p3496_p7), %s2659_s26, 1024  }
 0x2cc   : > { %4252 = vsyncadd (%p3496_p7), %s2659_s26, 4294966272  ;;  %s5397_s20 = sld [smem:[#allocation25_spill]]  ;;  %s5399_s17 = smov %s4259_s18 }
 0x2cd   : > { %s5398_s29 = sld [smem:[#allocation26_spill]]  ;;  %s5400_s18 = smov %s4263_s19 }
 0x2d2   : > { %p35_p11 = scmp.ge.s32.totalorder %s5397_s20, 6  }
 0x2d3   : > { %s5401_s19 = smov %s5398_s29 }
 0x2d4   :  { %37 = sbr.rel (!%p35_p11) target bundleno = 20 (0x14), region = 171 }
 0x2d9   :  { %2664 = vsyncpa [#allocation3], 1 }
 0x2da   :  { %2666 = vsyncpa [#allocation3 + $0x1], 1 }
 0x2db   :  { %2667 = vsyncpa [#allocation6], 1 }
 0x2dc   :  { %2669 = vsyncpa [#allocation6 + $0x1], 1 }
 0x2dd   :  { %2670 = vsyncpa [#allocation9], 1 }
 0x2de   :  { %2672 = vsyncpa [#allocation9 + $0x1], 1 }
 0x2df   :  { %2673 = vsyncpa [#allocation12], 1 }
 0x2e0   :  { %2674 = vsyncpa [#allocation4], 1 }
 0x2e1   :  { %2676 = vsyncpa [#allocation4 + $0x1], 1 }
 0x2e2   :  { %2677 = vsyncpa [#allocation16], 1 }
 0x2e3   :  { %2679 = vsyncpa [#allocation16 + $0x1], 1 }

</bundles_post_ra>
